<compile_context>
chip_gen: v7x
topology: tpu7x:2x2x1
jax: 0.10.0
libtpu: 0.0.40
codegen_flags: <defaults>
</compile_context>

<pallas_src>
import functools
import math

import jax
import jax.numpy as jnp
from jax import lax
from jax.experimental import pallas as pl
from jax.experimental.pallas import tpu as pltpu

LN_EPS = 1e-5
NEG_INF = -1e30  # large finite negative: robust vs. (-inf) - (-inf) = NaN


def _layer_norm_f32(x, gamma, beta):
    # LayerNorm in f32 regardless of compute dtype (cheap, keeps accuracy).
    x = x.astype(jnp.float32)
    mu = jnp.mean(x, axis=-1, keepdims=True)
    var = jnp.mean(jnp.square(x - mu), axis=-1, keepdims=True)
    return (x - mu) * lax.rsqrt(var + LN_EPS) * gamma + beta


def _transformer_block_kernel(
    # inputs
    xq_ref, xkv_ref,                    # x, sliced as query rows / kv rows
    g1_ref, b1_ref,                     # LayerNorm1
    wq_ref, wk_ref, wv_ref,             # (1, C, hs) per-head Q/K/V projections
    wp_ref,                             # (1, hs, C) per-head output-proj rows
    bp_ref,                             # attention output projection bias
    g2_ref, b2_ref,                     # LayerNorm2
    w1_ref, bm1_ref,                    # MLP fc1 (C -> 4C)
    w2_ref, bm2_ref,                    # MLP fc2 (4C -> C)
    # outputs
    o_ref,
    # scratch
    q_ref, m_ref, l_ref, acc_ref, proj_ref,
    *, block_q: int, block_k: int, sm_scale: float,
):
    qi = pl.program_id(1)
    h = pl.program_id(2)
    ki = pl.program_id(3)
    nh = pl.num_programs(2)
    nk = pl.num_programs(3)
    cdt = wq_ref.dtype                  # MXU operand dtype (f32 or bf16)

    # ---- (b, qi) start: zero the attention output-projection accumulator ----
    @pl.when((h == 0) & (ki == 0))
    def _init_proj():
        proj_ref[...] = jnp.zeros_like(proj_ref)

    # ---- (b, qi, h) start: project queries once, reset online-softmax state -
    @pl.when(ki == 0)
    def _init_head():
        hq = _layer_norm_f32(xq_ref[0], g1_ref[...], b1_ref[...])
        q = jnp.dot(hq.astype(cdt), wq_ref[0],
                    preferred_element_type=jnp.float32) * sm_scale
        q_ref[...] = q.astype(cdt)
        m_ref[...] = jnp.full_like(m_ref, NEG_INF)
        l_ref[...] = jnp.zeros_like(l_ref)
        acc_ref[...] = jnp.zeros_like(acc_ref)

    # ---- flash / online-softmax update for one KV block ----------------------
    # Blocks entirely in the causal future of this query block are skipped.
    @pl.when(ki * block_k < (qi + 1) * block_q)
    def _process_kv():
        hk = _layer_norm_f32(xkv_ref[0], g1_ref[...], b1_ref[...]).astype(cdt)
        k = jnp.dot(hk, wk_ref[0], preferred_element_type=jnp.float32)   # (TK, hs)
        v = jnp.dot(hk, wv_ref[0], preferred_element_type=jnp.float32)   # (TK, hs)

        # scores: (TQ, hs) contracted with (TK, hs) over the head dim
        s = lax.dot_general(q_ref[...], k.astype(cdt),
                            (((1,), (1,)), ((), ())),
                            preferred_element_type=jnp.float32)          # (TQ, TK)

        q_pos = qi * block_q + lax.broadcasted_iota(jnp.int32, s.shape, 0)
        k_pos = ki * block_k + lax.broadcasted_iota(jnp.int32, s.shape, 1)
        s = jnp.where(q_pos >= k_pos, s, NEG_INF)

        m_prev = m_ref[...]
        m_new = jnp.maximum(m_prev, jnp.max(s, axis=-1, keepdims=True))
        alpha = jnp.exp(m_prev - m_new)
        p = jnp.exp(s - m_new)                                           # (TQ, TK)
        l_ref[...] = alpha * l_ref[...] + jnp.sum(p, axis=-1, keepdims=True)
        acc_ref[...] = alpha * acc_ref[...] + jnp.dot(
            p.astype(cdt), v.astype(cdt), preferred_element_type=jnp.float32)
        m_ref[...] = m_new

    # ---- (b, qi, h) end: normalize, fold head into the output projection -----
    @pl.when(ki == nk - 1)
    def _finish_head():
        ctx = acc_ref[...] * pl.reciprocal(l_ref[...], approx=True)      # (TQ, hs)
        proj_ref[...] += jnp.dot(ctx.astype(cdt), wp_ref[0],
                                 preferred_element_type=jnp.float32)     # (TQ, C)

    # ---- (b, qi) end: bias + residual, LayerNorm2, MLP, residual, store ------
    @pl.when((h == nh - 1) & (ki == nk - 1))
    def _finish_block():
        x_q = xq_ref[0].astype(jnp.float32)
        x1 = x_q + proj_ref[...] + bp_ref[...]                           # residual 1
        h2 = _layer_norm_f32(x1, g2_ref[...], b2_ref[...])
        mh = jnp.dot(h2.astype(cdt), w1_ref[...],
                     preferred_element_type=jnp.float32) + bm1_ref[...]  # (TQ, 4C)
        # exact (erf-based) GELU, matching nn.GELU() default
        mh = 0.5 * mh * (1.0 + lax.erf(mh * (1.0 / math.sqrt(2.0))))
        mo = jnp.dot(mh.astype(cdt), w2_ref[...],
                     preferred_element_type=jnp.float32) + bm2_ref[...]  # (TQ, C)
        o_ref[0] = (x1 + mo).astype(o_ref.dtype)                         # residual 2


def _transformer_block(x, params, *, num_heads, block_q, block_k,
                       compute_dtype, single_buffer_weights, vmem_limit_bytes):
    B, T, C = x.shape
    assert C % num_heads == 0
    hs = C // num_heads
    TQ = min(block_q, T)
    TK = min(block_k, T)
    assert T % TQ == 0 and T % TK == 0, "T must be divisible by the block sizes"
    nq, nk = T // TQ, T // TK
    cdt = compute_dtype
    f32 = jnp.float32

    # Pre-pack weights head-major outside the kernel (plain XLA, free layout
    # work; a real model would do this once at load time).
    wq = params["wq"].reshape(C, num_heads, hs).transpose(1, 0, 2).astype(cdt)
    wk = params["wk"].reshape(C, num_heads, hs).transpose(1, 0, 2).astype(cdt)
    wv = params["wv"].reshape(C, num_heads, hs).transpose(1, 0, 2).astype(cdt)
    wp = params["wp"].reshape(num_heads, hs, C).astype(cdt)
    w1 = params["w1"].astype(cdt)
    w2 = params["w2"].astype(cdt)
    g1 = params["g1"].astype(f32)
    b1 = params["b1"].astype(f32)
    g2 = params["g2"].astype(f32)
    b2 = params["b2"].astype(f32)
    bp = params["bp"].astype(f32)
    bm1 = params["bm1"].astype(f32)
    bm2 = params["bm2"].astype(f32)

    single = single_buffer_weights and hasattr(pl, "Buffered")

    def const_spec(arr):
        # Full-array block whose index never changes across the grid.
        shape = arr.shape
        imap = lambda b, qi, h, ki: (0,) * len(shape)
        if single:
            # Constant-index weights only need one VMEM buffer (saves half the
            # weight VMEM vs. default double-buffering).
            return pl.BlockSpec(shape, imap, pipeline_mode=pl.Buffered(1))
        return pl.BlockSpec(shape, imap)

    def head_spec(arr):
        # Per-head (leading-dim) slice of a pre-packed (H, ..., ...) weight.
        shape = (1,) + arr.shape[1:]
        return pl.BlockSpec(
            shape, lambda b, qi, h, ki: (h,) + (0,) * (len(shape) - 1))

    in_specs = [
        pl.BlockSpec((1, TQ, C), lambda b, qi, h, ki: (b, qi, 0)),   # x (query rows)
        pl.BlockSpec((1, TK, C), lambda b, qi, h, ki: (b, ki, 0)),   # x (kv rows)
        const_spec(g1), const_spec(b1),
        head_spec(wq), head_spec(wk), head_spec(wv), head_spec(wp),
        const_spec(bp),
        const_spec(g2), const_spec(b2),
        const_spec(w1), const_spec(bm1), const_spec(w2), const_spec(bm2),
    ]
    out_specs = pl.BlockSpec((1, TQ, C), lambda b, qi, h, ki: (b, qi, 0))

    scratch_shapes = [
        pltpu.VMEM((TQ, hs), cdt),    # scaled query block for current head
        pltpu.VMEM((TQ, 1), f32),     # running row max   (online softmax)
        pltpu.VMEM((TQ, 1), f32),     # running row denom (online softmax)
        pltpu.VMEM((TQ, hs), f32),    # per-head context accumulator
        pltpu.VMEM((TQ, C), f32),     # attention output-projection accumulator
    ]

    kernel = functools.partial(
        _transformer_block_kernel,
        block_q=TQ, block_k=TK, sm_scale=1.0 / math.sqrt(hs))

    return pl.pallas_call(
        kernel,
        out_shape=jax.ShapeDtypeStruct((B, T, C), x.dtype),
        grid=(B, nq, num_heads, nk),
        in_specs=in_specs,
        out_specs=out_specs,
        scratch_shapes=scratch_shapes,
        compiler_params=pltpu.CompilerParams(
            dimension_semantics=("parallel", "parallel", "arbitrary", "arbitrary"),
            vmem_limit_bytes=vmem_limit_bytes),
    )(x, x, g1, b1, wq, wk, wv, wp, bp, g2, b2, w1, bm1, w2, bm2)


def transformer_block(x, params, *, num_heads, block_q=128, block_k=128,
                      compute_dtype=jnp.float32,
                      vmem_limit_bytes=48 * 1024 * 1024):
    kwargs = dict(num_heads=num_heads, block_q=block_q, block_k=block_k,
                  compute_dtype=compute_dtype, vmem_limit_bytes=vmem_limit_bytes)
    try:
        return _transformer_block(x, params, single_buffer_weights=True, **kwargs)
    except Exception:
        # pipeline_mode / pl.Buffered(1) not supported on this JAX build:
        # fall back to default double-buffered weight specs.
        return _transformer_block(x, params, single_buffer_weights=False, **kwargs)


# ----------------------------- parameter init --------------------------------
def init_params(key, embed_size):
    C = embed_size
    ks = jax.random.split(key, 12)

    def linear_w(k, fan_in, fan_out):
        # PyTorch nn.Linear default: U(-1/sqrt(fan_in), 1/sqrt(fan_in)).
        # Stored as (in, out) so the kernel computes x @ W.
        bound = 1.0 / math.sqrt(fan_in)
        return jax.random.uniform(k, (fan_in, fan_out), jnp.float32, -bound, bound)

    def linear_b(k, fan_in, fan_out):
        bound = 1.0 / math.sqrt(fan_in)
        return jax.random.uniform(k, (1, fan_out), jnp.float32, -bound, bound)

    return {
        "g1": jnp.ones((1, C), jnp.float32),
        "b1": jnp.zeros((1, C), jnp.float32),
        "wq": linear_w(ks[0], C, C),
        "wk": linear_w(ks[1], C, C),
        "wv": linear_w(ks[2], C, C),
        "wp": linear_w(ks[3], C, C),
        "bp": linear_b(ks[4], C, C),
        "g2": jnp.ones((1, C), jnp.float32),
        "b2": jnp.zeros((1, C), jnp.float32),
        "w1": linear_w(ks[5], C, 4 * C),
        "bm1": linear_b(ks[6], C, 4 * C),
        "w2": linear_w(ks[7], 4 * C, C),
        "bm2": linear_b(ks[8], 4 * C, C),
    }


# ----------------------------- pure-JAX reference -----------------------------
def reference(x, p, *, num_heads):
    B, T, C = x.shape
    hs = C // num_heads

    def ln(v, g, b):
        mu = jnp.mean(v, -1, keepdims=True)
        var = jnp.mean((v - mu) ** 2, -1, keepdims=True)
        return (v - mu) / jnp.sqrt(var + LN_EPS) * g + b

    h = ln(x, p["g1"], p["b1"])
    q = (h @ p["wq"]).reshape(B, T, num_heads, hs).transpose(0, 2, 1, 3)
    k = (h @ p["wk"]).reshape(B, T, num_heads, hs).transpose(0, 2, 1, 3)
    v = (h @ p["wv"]).reshape(B, T, num_heads, hs).transpose(0, 2, 1, 3)
    att = (q @ jnp.swapaxes(k, -2, -1)) / math.sqrt(hs)
    mask = jnp.tril(jnp.ones((T, T), bool))
    att = jnp.where(mask, att, -jnp.inf)
    att = jax.nn.softmax(att, axis=-1)
    out = (att @ v).transpose(0, 2, 1, 3).reshape(B, T, C)
    out = out @ p["wp"] + p["bp"]
    x1 = x + out
    h2 = ln(x1, p["g2"], p["b2"])
    m = h2 @ p["w1"] + p["bm1"]
    m = jax.nn.gelu(m, approximate=False)
    m = m @ p["w2"] + p["bm2"]
    return x1 + m


if __name__ == "__main__":
    # batch, seq (= block_size), embed, heads -- small but multi-block so the
    # flash KV loop, causal-block skipping and multi-head accumulation all run.
    B, T, C, H = 2, 16, 32, 4
    key = jax.random.PRNGKey(0)
    kx, kp = jax.random.split(key)
    x = jax.random.normal(kx, (B, T, C), jnp.float32)
    params = init_params(kp, C)

    ref = reference(x, params, num_heads=H)

    # f32 MXU path, T tiled into 8-row query/kv blocks (exercises online softmax).
    out_f32 = transformer_block(x, params, num_heads=H, block_q=8, block_k=8,
                                compute_dtype=jnp.float32)
    out_f32 = jax.block_until_ready(out_f32)
    assert out_f32.shape == (B, T, C)
    assert jnp.allclose(out_f32, ref, rtol=1e-2, atol=1e-2), "f32 kernel mismatch"

    # bf16 MXU-operand path (f32 accumulation, f32 LN/softmax/GELU), full blocks.
    out_bf16 = transformer_block(x, params, num_heads=H,
                                 compute_dtype=jnp.bfloat16)
    out_bf16 = jax.block_until_ready(out_bf16)
    assert out_bf16.shape == (B, T, C)
    assert jnp.allclose(out_bf16, ref, rtol=5e-2, atol=5e-2), "bf16 kernel mismatch"

    print("KERNEL_OK")
</pallas_src>

<mosaic_0001>
module attributes {stable_mosaic.version = 11 : i64} {
  func.func @_transformer_block_kernel(%arg0: i32, %arg1: i32, %arg2: i32, %arg3: i32, %arg4: memref<1x8x32xf32, #tpu.memory_space<vmem>>, %arg5: memref<1x8x32xf32, #tpu.memory_space<vmem>>, %arg6: memref<1x32xf32, #tpu.memory_space<vmem>>, %arg7: memref<1x32xf32, #tpu.memory_space<vmem>>, %arg8: memref<1x32x8xf32, #tpu.memory_space<vmem>>, %arg9: memref<1x32x8xf32, #tpu.memory_space<vmem>>, %arg10: memref<1x32x8xf32, #tpu.memory_space<vmem>>, %arg11: memref<1x8x32xf32, #tpu.memory_space<vmem>>, %arg12: memref<1x32xf32, #tpu.memory_space<vmem>>, %arg13: memref<1x32xf32, #tpu.memory_space<vmem>>, %arg14: memref<1x32xf32, #tpu.memory_space<vmem>>, %arg15: memref<32x128xf32, #tpu.memory_space<vmem>>, %arg16: memref<1x128xf32, #tpu.memory_space<vmem>>, %arg17: memref<128x32xf32, #tpu.memory_space<vmem>>, %arg18: memref<1x32xf32, #tpu.memory_space<vmem>>, %arg19: memref<1x8x32xf32, #tpu.memory_space<vmem>>, %arg20: memref<8x8xf32, #tpu.memory_space<vmem>>, %arg21: memref<8x1xf32, #tpu.memory_space<vmem>>, %arg22: memref<8x1xf32, #tpu.memory_space<vmem>>, %arg23: memref<8x8xf32, #tpu.memory_space<vmem>>, %arg24: memref<8x32xf32, #tpu.memory_space<vmem>>) attributes {dimension_semantics = [#tpu.dimension_semantics<parallel>, #tpu.dimension_semantics<parallel>, #tpu.dimension_semantics<arbitrary>, #tpu.dimension_semantics<arbitrary>], iteration_bounds = array<i64: 2, 2, 4, 2>, scalar_prefetch = 0 : i64, scratch_operands = 5 : i64, tpu.core_type = #tpu.core_type<tc>, window_params = [{transform_indices = @transform_0, window_bounds = array<i64: 1, 8, 32>}, {transform_indices = @transform_1, window_bounds = array<i64: 1, 8, 32>}, {pipeline_mode = #tpu.pipeline_mode<synchronous>, transform_indices = @transform_2, window_bounds = array<i64: 1, 32>}, {pipeline_mode = #tpu.pipeline_mode<synchronous>, transform_indices = @transform_3, window_bounds = array<i64: 1, 32>}, {transform_indices = @transform_4, window_bounds = array<i64: 1, 32, 8>}, {transform_indices = @transform_5, window_bounds = array<i64: 1, 32, 8>}, {transform_indices = @transform_6, window_bounds = array<i64: 1, 32, 8>}, {transform_indices = @transform_7, window_bounds = array<i64: 1, 8, 32>}, {pipeline_mode = #tpu.pipeline_mode<synchronous>, transform_indices = @transform_8, window_bounds = array<i64: 1, 32>}, {pipeline_mode = #tpu.pipeline_mode<synchronous>, transform_indices = @transform_9, window_bounds = array<i64: 1, 32>}, {pipeline_mode = #tpu.pipeline_mode<synchronous>, transform_indices = @transform_10, window_bounds = array<i64: 1, 32>}, {pipeline_mode = #tpu.pipeline_mode<synchronous>, transform_indices = @transform_11, window_bounds = array<i64: 32, 128>}, {pipeline_mode = #tpu.pipeline_mode<synchronous>, transform_indices = @transform_12, window_bounds = array<i64: 1, 128>}, {pipeline_mode = #tpu.pipeline_mode<synchronous>, transform_indices = @transform_13, window_bounds = array<i64: 128, 32>}, {pipeline_mode = #tpu.pipeline_mode<synchronous>, transform_indices = @transform_14, window_bounds = array<i64: 1, 32>}, {transform_indices = @transform_15, window_bounds = array<i64: 1, 8, 32>}]} {
    %c0_i32 = arith.constant 0 : i32
    %0 = arith.cmpi eq, %arg2, %c0_i32 : i32
    %c0_i32_0 = arith.constant 0 : i32
    %1 = arith.cmpi eq, %arg3, %c0_i32_0 : i32
    %2 = arith.andi %0, %1 : i1
    %3 = arith.extui %2 : i1 to i32
    %c0_i32_1 = arith.constant 0 : i32
    %4 = arith.cmpi ne, %3, %c0_i32_1 : i32
    scf.if %4 {
      %cst = arith.constant 0.000000e+00 : f32
      %22 = vector.broadcast %cst : f32 to vector<8x32xf32>
      %c0 = arith.constant 0 : index
      %c0_10 = arith.constant 0 : index
      %23 = vector.load %arg24[%c0, %c0_10] : memref<8x32xf32, #tpu.memory_space<vmem>>, vector<8x32xf32>
      tpu.vector_store %arg24[%c0, %c0_10], %22 {strides = array<i32>} : memref<8x32xf32, #tpu.memory_space<vmem>>, vector<8x32xf32>,
    } else {
    }
    %c0_i32_2 = arith.constant 0 : i32
    %5 = arith.cmpi eq, %arg3, %c0_i32_2 : i32
    %6 = arith.extui %5 : i1 to i32
    %c0_i32_3 = arith.constant 0 : i32
    %7 = arith.cmpi ne, %6, %c0_i32_3 : i32
    scf.if %7 {
      %c0 = arith.constant 0 : index
      %c0_10 = arith.constant 0 : index
      %c0_11 = arith.constant 0 : index
      %22 = vector.load %arg4[%c0, %c0_10, %c0_11] : memref<1x8x32xf32, #tpu.memory_space<vmem>>, vector<1x8x32xf32>
      %23 = vector.shape_cast %22 : vector<1x8x32xf32> to vector<8x32xf32>
      %c0_12 = arith.constant 0 : index
      %c0_13 = arith.constant 0 : index
      %24 = vector.load %arg6[%c0_12, %c0_13] : memref<1x32xf32, #tpu.memory_space<vmem>>, vector<1x32xf32>
      %c0_14 = arith.constant 0 : index
      %c0_15 = arith.constant 0 : index
      %25 = vector.load %arg7[%c0_14, %c0_15] : memref<1x32xf32, #tpu.memory_space<vmem>>, vector<1x32xf32>
      %cst = arith.constant dense<0.000000e+00> : vector<8xf32>
      %26 = vector.multi_reduction <add>, %23, %cst [1] : vector<8x32xf32> to vector<8xf32>
      %27 = vector.shape_cast %26 : vector<8xf32> to vector<8x1xf32>
      %cst_16 = arith.constant 3.200000e+01 : f32
      %28 = vector.broadcast %cst_16 : f32 to vector<8x1xf32>
      %29 = arith.divf %27, %28 : vector<8x1xf32>
      %30 = vector.broadcast %29 : vector<8x1xf32> to vector<8x32xf32>
      %31 = arith.subf %23, %30 : vector<8x32xf32>
      %32 = arith.mulf %31, %31 : vector<8x32xf32>
      %cst_17 = arith.constant dense<0.000000e+00> : vector<8xf32>
      %33 = vector.multi_reduction <add>, %32, %cst_17 [1] : vector<8x32xf32> to vector<8xf32>
      %34 = vector.shape_cast %33 : vector<8xf32> to vector<8x1xf32>
      %cst_18 = arith.constant 3.200000e+01 : f32
      %35 = vector.broadcast %cst_18 : f32 to vector<8x1xf32>
      %36 = arith.divf %34, %35 : vector<8x1xf32>
      %37 = vector.broadcast %29 : vector<8x1xf32> to vector<8x32xf32>
      %38 = arith.subf %23, %37 : vector<8x32xf32>
      %cst_19 = arith.constant 9.99999974E-6 : f32
      %39 = vector.broadcast %cst_19 : f32 to vector<8x1xf32>
      %40 = arith.addf %36, %39 : vector<8x1xf32>
      %41 = math.rsqrt %40 : vector<8x1xf32>
      %42 = vector.broadcast %41 : vector<8x1xf32> to vector<8x32xf32>
      %43 = arith.mulf %38, %42 : vector<8x32xf32>
      %44 = vector.broadcast %24 : vector<1x32xf32> to vector<8x32xf32>
      %45 = arith.mulf %43, %44 : vector<8x32xf32>
      %46 = vector.broadcast %25 : vector<1x32xf32> to vector<8x32xf32>
      %47 = arith.addf %45, %46 : vector<8x32xf32>
      %c0_20 = arith.constant 0 : index
      %c0_21 = arith.constant 0 : index
      %c0_22 = arith.constant 0 : index
      %48 = vector.load %arg8[%c0_20, %c0_21, %c0_22] : memref<1x32x8xf32, #tpu.memory_space<vmem>>, vector<1x32x8xf32>
      %49 = vector.shape_cast %48 : vector<1x32x8xf32> to vector<32x8xf32>
      %cst_23 = arith.constant dense<0.000000e+00> : vector<8x8xf32>
      %50 = tpu.matmul %47, %49, %cst_23 {dimension_numbers = #tpu.dot_dimension_numbers<[1], [0], [0], [1], [0, 0, 1, 1], [], []>} : vector<8x32xf32>, vector<32x8xf32>, vector<8x8xf32> -> vector<8x8xf32>
      %cst_24 = arith.constant 0.353553385 : f32
      %51 = vector.broadcast %cst_24 : f32 to vector<8x8xf32>
      %52 = arith.mulf %50, %51 : vector<8x8xf32>
      %c0_25 = arith.constant 0 : index
      %c0_26 = arith.constant 0 : index
      %53 = vector.load %arg20[%c0_25, %c0_26] : memref<8x8xf32, #tpu.memory_space<vmem>>, vector<8x8xf32>
      tpu.vector_store %arg20[%c0_25, %c0_26], %52 {strides = array<i32>} : memref<8x8xf32, #tpu.memory_space<vmem>>, vector<8x8xf32>,
      %cst_27 = arith.constant -1.000000e+30 : f32
      %54 = vector.broadcast %cst_27 : f32 to vector<8x1xf32>
      %c0_28 = arith.constant 0 : index
      %c0_29 = arith.constant 0 : index
      %55 = vector.load %arg21[%c0_28, %c0_29] : memref<8x1xf32, #tpu.memory_space<vmem>>, vector<8x1xf32>
      tpu.vector_store %arg21[%c0_28, %c0_29], %54 {strides = array<i32>} : memref<8x1xf32, #tpu.memory_space<vmem>>, vector<8x1xf32>,
      %cst_30 = arith.constant 0.000000e+00 : f32
      %56 = vector.broadcast %cst_30 : f32 to vector<8x1xf32>
      %c0_31 = arith.constant 0 : index
      %c0_32 = arith.constant 0 : index
      %57 = vector.load %arg22[%c0_31, %c0_32] : memref<8x1xf32, #tpu.memory_space<vmem>>, vector<8x1xf32>
      tpu.vector_store %arg22[%c0_31, %c0_32], %56 {strides = array<i32>} : memref<8x1xf32, #tpu.memory_space<vmem>>, vector<8x1xf32>,
      %cst_33 = arith.constant 0.000000e+00 : f32
      %58 = vector.broadcast %cst_33 : f32 to vector<8x8xf32>
      %c0_34 = arith.constant 0 : index
      %c0_35 = arith.constant 0 : index
      %59 = vector.load %arg23[%c0_34, %c0_35] : memref<8x8xf32, #tpu.memory_space<vmem>>, vector<8x8xf32>
      tpu.vector_store %arg23[%c0_34, %c0_35], %58 {strides = array<i32>} : memref<8x8xf32, #tpu.memory_space<vmem>>, vector<8x8xf32>,
    } else {
    }
    %c8_i32 = arith.constant 8 : i32
    %8 = arith.muli %arg3, %c8_i32 : i32
    %c1_i32 = arith.constant 1 : i32
    %9 = arith.addi %arg1, %c1_i32 : i32
    %c8_i32_4 = arith.constant 8 : i32
    %10 = arith.muli %9, %c8_i32_4 : i32
    %11 = arith.cmpi slt, %8, %10 : i32
    %12 = arith.extui %11 : i1 to i32
    %c0_i32_5 = arith.constant 0 : i32
    %13 = arith.cmpi ne, %12, %c0_i32_5 : i32
    scf.if %13 {
      %c0 = arith.constant 0 : index
      %c0_10 = arith.constant 0 : index
      %c0_11 = arith.constant 0 : index
      %22 = vector.load %arg5[%c0, %c0_10, %c0_11] : memref<1x8x32xf32, #tpu.memory_space<vmem>>, vector<1x8x32xf32>
      %23 = vector.shape_cast %22 : vector<1x8x32xf32> to vector<8x32xf32>
      %c0_12 = arith.constant 0 : index
      %c0_13 = arith.constant 0 : index
      %24 = vector.load %arg6[%c0_12, %c0_13] : memref<1x32xf32, #tpu.memory_space<vmem>>, vector<1x32xf32>
      %c0_14 = arith.constant 0 : index
      %c0_15 = arith.constant 0 : index
      %25 = vector.load %arg7[%c0_14, %c0_15] : memref<1x32xf32, #tpu.memory_space<vmem>>, vector<1x32xf32>
      %cst = arith.constant dense<0.000000e+00> : vector<8xf32>
      %26 = vector.multi_reduction <add>, %23, %cst [1] : vector<8x32xf32> to vector<8xf32>
      %27 = vector.shape_cast %26 : vector<8xf32> to vector<8x1xf32>
      %cst_16 = arith.constant 3.200000e+01 : f32
      %28 = vector.broadcast %cst_16 : f32 to vector<8x1xf32>
      %29 = arith.divf %27, %28 : vector<8x1xf32>
      %30 = vector.broadcast %29 : vector<8x1xf32> to vector<8x32xf32>
      %31 = arith.subf %23, %30 : vector<8x32xf32>
      %32 = arith.mulf %31, %31 : vector<8x32xf32>
      %cst_17 = arith.constant dense<0.000000e+00> : vector<8xf32>
      %33 = vector.multi_reduction <add>, %32, %cst_17 [1] : vector<8x32xf32> to vector<8xf32>
      %34 = vector.shape_cast %33 : vector<8xf32> to vector<8x1xf32>
      %cst_18 = arith.constant 3.200000e+01 : f32
      %35 = vector.broadcast %cst_18 : f32 to vector<8x1xf32>
      %36 = arith.divf %34, %35 : vector<8x1xf32>
      %37 = vector.broadcast %29 : vector<8x1xf32> to vector<8x32xf32>
      %38 = arith.subf %23, %37 : vector<8x32xf32>
      %cst_19 = arith.constant 9.99999974E-6 : f32
      %39 = vector.broadcast %cst_19 : f32 to vector<8x1xf32>
      %40 = arith.addf %36, %39 : vector<8x1xf32>
      %41 = math.rsqrt %40 : vector<8x1xf32>
      %42 = vector.broadcast %41 : vector<8x1xf32> to vector<8x32xf32>
      %43 = arith.mulf %38, %42 : vector<8x32xf32>
      %44 = vector.broadcast %24 : vector<1x32xf32> to vector<8x32xf32>
      %45 = arith.mulf %43, %44 : vector<8x32xf32>
      %46 = vector.broadcast %25 : vector<1x32xf32> to vector<8x32xf32>
      %47 = arith.addf %45, %46 : vector<8x32xf32>
      %c0_20 = arith.constant 0 : index
      %c0_21 = arith.constant 0 : index
      %c0_22 = arith.constant 0 : index
      %48 = vector.load %arg9[%c0_20, %c0_21, %c0_22] : memref<1x32x8xf32, #tpu.memory_space<vmem>>, vector<1x32x8xf32>
      %49 = vector.shape_cast %48 : vector<1x32x8xf32> to vector<32x8xf32>
      %cst_23 = arith.constant dense<0.000000e+00> : vector<8x8xf32>
      %50 = tpu.matmul %47, %49, %cst_23 {dimension_numbers = #tpu.dot_dimension_numbers<[1], [0], [0], [1], [0, 0, 1, 1], [], []>} : vector<8x32xf32>, vector<32x8xf32>, vector<8x8xf32> -> vector<8x8xf32>
      %c0_24 = arith.constant 0 : index
      %c0_25 = arith.constant 0 : index
      %c0_26 = arith.constant 0 : index
      %51 = vector.load %arg10[%c0_24, %c0_25, %c0_26] : memref<1x32x8xf32, #tpu.memory_space<vmem>>, vector<1x32x8xf32>
      %52 = vector.shape_cast %51 : vector<1x32x8xf32> to vector<32x8xf32>
      %cst_27 = arith.constant dense<0.000000e+00> : vector<8x8xf32>
      %53 = tpu.matmul %47, %52, %cst_27 {dimension_numbers = #tpu.dot_dimension_numbers<[1], [0], [0], [1], [0, 0, 1, 1], [], []>} : vector<8x32xf32>, vector<32x8xf32>, vector<8x8xf32> -> vector<8x8xf32>
      %c0_28 = arith.constant 0 : index
      %c0_29 = arith.constant 0 : index
      %54 = vector.load %arg20[%c0_28, %c0_29] : memref<8x8xf32, #tpu.memory_space<vmem>>, vector<8x8xf32>
      %cst_30 = arith.constant dense<0.000000e+00> : vector<8x8xf32>
      %55 = tpu.matmul %54, %50, %cst_30 {dimension_numbers = #tpu.dot_dimension_numbers<[1], [1], [0], [0], [0, 0, 1, 0], [], []>} : vector<8x8xf32>, vector<8x8xf32>, vector<8x8xf32> -> vector<8x8xf32>
      %c8_i32_31 = arith.constant 8 : i32
      %56 = arith.muli %arg1, %c8_i32_31 : i32
      %57 = tpu.iota {dimensions = array<i32: 0>} : vector<8x8xi32>
      %58 = vector.broadcast %56 : i32 to vector<8x8xi32>
      %59 = arith.addi %58, %57 : vector<8x8xi32>
      %c8_i32_32 = arith.constant 8 : i32
      %60 = arith.muli %arg3, %c8_i32_32 : i32
      %61 = tpu.iota {dimensions = array<i32: 1>} : vector<8x8xi32>
      %62 = vector.broadcast %60 : i32 to vector<8x8xi32>
      %63 = arith.addi %62, %61 : vector<8x8xi32>
      %64 = arith.cmpi sge, %59, %63 : vector<8x8xi32>
      %cst_33 = arith.constant -1.000000e+30 : f32
      %65 = vector.broadcast %cst_33 : f32 to vector<8x8xf32>
      %66 = arith.select %64, %55, %65 : vector<8x8xi1>, vector<8x8xf32>
      %c0_34 = arith.constant 0 : index
      %c0_35 = arith.constant 0 : index
      %67 = vector.load %arg21[%c0_34, %c0_35] : memref<8x1xf32, #tpu.memory_space<vmem>>, vector<8x1xf32>
      %cst_36 = arith.constant dense<0xFF800000> : vector<8xf32>
      %68 = vector.multi_reduction <maximumf>, %66, %cst_36 [1] : vector<8x8xf32> to vector<8xf32>
      %69 = vector.shape_cast %68 : vector<8xf32> to vector<8x1xf32>
      %70 = arith.maximumf %67, %69 : vector<8x1xf32>
      %71 = arith.subf %67, %70 : vector<8x1xf32>
      %72 = math.exp %71 : vector<8x1xf32>
      %73 = vector.broadcast %70 : vector<8x1xf32> to vector<8x8xf32>
      %74 = arith.subf %66, %73 : vector<8x8xf32>
      %75 = math.exp %74 : vector<8x8xf32>
      %c0_37 = arith.constant 0 : index
      %c0_38 = arith.constant 0 : index
      %76 = vector.load %arg22[%c0_37, %c0_38] : memref<8x1xf32, #tpu.memory_space<vmem>>, vector<8x1xf32>
      %77 = arith.mulf %72, %76 : vector<8x1xf32>
      %cst_39 = arith.constant dense<0.000000e+00> : vector<8xf32>
      %78 = vector.multi_reduction <add>, %75, %cst_39 [1] : vector<8x8xf32> to vector<8xf32>
      %79 = vector.shape_cast %78 : vector<8xf32> to vector<8x1xf32>
      %80 = arith.addf %77, %79 : vector<8x1xf32>
      %c0_40 = arith.constant 0 : index
      %c0_41 = arith.constant 0 : index
      %81 = vector.load %arg22[%c0_40, %c0_41] : memref<8x1xf32, #tpu.memory_space<vmem>>, vector<8x1xf32>
      tpu.vector_store %arg22[%c0_40, %c0_41], %80 {strides = array<i32>} : memref<8x1xf32, #tpu.memory_space<vmem>>, vector<8x1xf32>,
      %c0_42 = arith.constant 0 : index
      %c0_43 = arith.constant 0 : index
      %82 = vector.load %arg23[%c0_42, %c0_43] : memref<8x8xf32, #tpu.memory_space<vmem>>, vector<8x8xf32>
      %83 = vector.broadcast %72 : vector<8x1xf32> to vector<8x8xf32>
      %84 = arith.mulf %83, %82 : vector<8x8xf32>
      %cst_44 = arith.constant dense<0.000000e+00> : vector<8x8xf32>
      %85 = tpu.matmul %75, %53, %cst_44 {dimension_numbers = #tpu.dot_dimension_numbers<[1], [0], [0], [1], [0, 0, 1, 1], [], []>} : vector<8x8xf32>, vector<8x8xf32>, vector<8x8xf32> -> vector<8x8xf32>
      %86 = arith.addf %84, %85 : vector<8x8xf32>
      %c0_45 = arith.constant 0 : index
      %c0_46 = arith.constant 0 : index
      %87 = vector.load %arg23[%c0_45, %c0_46] : memref<8x8xf32, #tpu.memory_space<vmem>>, vector<8x8xf32>
      tpu.vector_store %arg23[%c0_45, %c0_46], %86 {strides = array<i32>} : memref<8x8xf32, #tpu.memory_space<vmem>>, vector<8x8xf32>,
      %c0_47 = arith.constant 0 : index
      %c0_48 = arith.constant 0 : index
      %88 = vector.load %arg21[%c0_47, %c0_48] : memref<8x1xf32, #tpu.memory_space<vmem>>, vector<8x1xf32>
      tpu.vector_store %arg21[%c0_47, %c0_48], %70 {strides = array<i32>} : memref<8x1xf32, #tpu.memory_space<vmem>>, vector<8x1xf32>,
    } else {
    }
    %c1_i32_6 = arith.constant 1 : i32
    %14 = arith.cmpi eq, %arg3, %c1_i32_6 : i32
    %15 = arith.extui %14 : i1 to i32
    %c0_i32_7 = arith.constant 0 : i32
    %16 = arith.cmpi ne, %15, %c0_i32_7 : i32
    scf.if %16 {
      %c0 = arith.constant 0 : index
      %c0_10 = arith.constant 0 : index
      %22 = vector.load %arg23[%c0, %c0_10] : memref<8x8xf32, #tpu.memory_space<vmem>>, vector<8x8xf32>
      %c0_11 = arith.constant 0 : index
      %c0_12 = arith.constant 0 : index
      %23 = vector.load %arg22[%c0_11, %c0_12] : memref<8x1xf32, #tpu.memory_space<vmem>>, vector<8x1xf32>
      %24 = tpu.reciprocal %23 {approx = true} : vector<8x1xf32> -> vector<8x1xf32>
      %25 = vector.broadcast %24 : vector<8x1xf32> to vector<8x8xf32>
      %26 = arith.mulf %22, %25 : vector<8x8xf32>
      %c0_13 = arith.constant 0 : index
      %c0_14 = arith.constant 0 : index
      %27 = vector.load %arg24[%c0_13, %c0_14] : memref<8x32xf32, #tpu.memory_space<vmem>>, vector<8x32xf32>
      %c0_15 = arith.constant 0 : index
      %c0_16 = arith.constant 0 : index
      %c0_17 = arith.constant 0 : index
      %28 = vector.load %arg11[%c0_15, %c0_16, %c0_17] : memref<1x8x32xf32, #tpu.memory_space<vmem>>, vector<1x8x32xf32>
      %29 = vector.shape_cast %28 : vector<1x8x32xf32> to vector<8x32xf32>
      %cst = arith.constant dense<0.000000e+00> : vector<8x32xf32>
      %30 = tpu.matmul %26, %29, %cst {dimension_numbers = #tpu.dot_dimension_numbers<[1], [0], [0], [1], [0, 0, 1, 1], [], []>} : vector<8x8xf32>, vector<8x32xf32>, vector<8x32xf32> -> vector<8x32xf32>
      %31 = arith.addf %27, %30 : vector<8x32xf32>
      %c0_18 = arith.constant 0 : index
      %c0_19 = arith.constant 0 : index
      %32 = vector.load %arg24[%c0_18, %c0_19] : memref<8x32xf32, #tpu.memory_space<vmem>>, vector<8x32xf32>
      tpu.vector_store %arg24[%c0_18, %c0_19], %31 {strides = array<i32>} : memref<8x32xf32, #tpu.memory_space<vmem>>, vector<8x32xf32>,
    } else {
    }
    %c3_i32 = arith.constant 3 : i32
    %17 = arith.cmpi eq, %arg2, %c3_i32 : i32
    %c1_i32_8 = arith.constant 1 : i32
    %18 = arith.cmpi eq, %arg3, %c1_i32_8 : i32
    %19 = arith.andi %17, %18 : i1
    %20 = arith.extui %19 : i1 to i32
    %c0_i32_9 = arith.constant 0 : i32
    %21 = arith.cmpi ne, %20, %c0_i32_9 : i32
    scf.if %21 {
      %c0 = arith.constant 0 : index
      %c0_10 = arith.constant 0 : index
      %c0_11 = arith.constant 0 : index
      %22 = vector.load %arg4[%c0, %c0_10, %c0_11] : memref<1x8x32xf32, #tpu.memory_space<vmem>>, vector<1x8x32xf32>
      %23 = vector.shape_cast %22 : vector<1x8x32xf32> to vector<8x32xf32>
      %c0_12 = arith.constant 0 : index
      %c0_13 = arith.constant 0 : index
      %24 = vector.load %arg24[%c0_12, %c0_13] : memref<8x32xf32, #tpu.memory_space<vmem>>, vector<8x32xf32>
      %25 = arith.addf %23, %24 : vector<8x32xf32>
      %c0_14 = arith.constant 0 : index
      %c0_15 = arith.constant 0 : index
      %26 = vector.load %arg12[%c0_14, %c0_15] : memref<1x32xf32, #tpu.memory_space<vmem>>, vector<1x32xf32>
      %27 = vector.broadcast %26 : vector<1x32xf32> to vector<8x32xf32>
      %28 = arith.addf %25, %27 : vector<8x32xf32>
      %c0_16 = arith.constant 0 : index
      %c0_17 = arith.constant 0 : index
      %29 = vector.load %arg13[%c0_16, %c0_17] : memref<1x32xf32, #tpu.memory_space<vmem>>, vector<1x32xf32>
      %c0_18 = arith.constant 0 : index
      %c0_19 = arith.constant 0 : index
      %30 = vector.load %arg14[%c0_18, %c0_19] : memref<1x32xf32, #tpu.memory_space<vmem>>, vector<1x32xf32>
      %cst = arith.constant dense<0.000000e+00> : vector<8xf32>
      %31 = vector.multi_reduction <add>, %28, %cst [1] : vector<8x32xf32> to vector<8xf32>
      %32 = vector.shape_cast %31 : vector<8xf32> to vector<8x1xf32>
      %cst_20 = arith.constant 3.200000e+01 : f32
      %33 = vector.broadcast %cst_20 : f32 to vector<8x1xf32>
      %34 = arith.divf %32, %33 : vector<8x1xf32>
      %35 = vector.broadcast %34 : vector<8x1xf32> to vector<8x32xf32>
      %36 = arith.subf %28, %35 : vector<8x32xf32>
      %37 = arith.mulf %36, %36 : vector<8x32xf32>
      %cst_21 = arith.constant dense<0.000000e+00> : vector<8xf32>
      %38 = vector.multi_reduction <add>, %37, %cst_21 [1] : vector<8x32xf32> to vector<8xf32>
      %39 = vector.shape_cast %38 : vector<8xf32> to vector<8x1xf32>
      %cst_22 = arith.constant 3.200000e+01 : f32
      %40 = vector.broadcast %cst_22 : f32 to vector<8x1xf32>
      %41 = arith.divf %39, %40 : vector<8x1xf32>
      %42 = vector.broadcast %34 : vector<8x1xf32> to vector<8x32xf32>
      %43 = arith.subf %28, %42 : vector<8x32xf32>
      %cst_23 = arith.constant 9.99999974E-6 : f32
      %44 = vector.broadcast %cst_23 : f32 to vector<8x1xf32>
      %45 = arith.addf %41, %44 : vector<8x1xf32>
      %46 = math.rsqrt %45 : vector<8x1xf32>
      %47 = vector.broadcast %46 : vector<8x1xf32> to vector<8x32xf32>
      %48 = arith.mulf %43, %47 : vector<8x32xf32>
      %49 = vector.broadcast %29 : vector<1x32xf32> to vector<8x32xf32>
      %50 = arith.mulf %48, %49 : vector<8x32xf32>
      %51 = vector.broadcast %30 : vector<1x32xf32> to vector<8x32xf32>
      %52 = arith.addf %50, %51 : vector<8x32xf32>
      %c0_24 = arith.constant 0 : index
      %c0_25 = arith.constant 0 : index
      %53 = vector.load %arg15[%c0_24, %c0_25] : memref<32x128xf32, #tpu.memory_space<vmem>>, vector<32x128xf32>
      %cst_26 = arith.constant dense<0.000000e+00> : vector<8x128xf32>
      %54 = tpu.matmul %52, %53, %cst_26 {dimension_numbers = #tpu.dot_dimension_numbers<[1], [0], [0], [1], [0, 0, 1, 1], [], []>} : vector<8x32xf32>, vector<32x128xf32>, vector<8x128xf32> -> vector<8x128xf32>
      %c0_27 = arith.constant 0 : index
      %c0_28 = arith.constant 0 : index
      %55 = vector.load %arg16[%c0_27, %c0_28] : memref<1x128xf32, #tpu.memory_space<vmem>>, vector<1x128xf32>
      %56 = vector.broadcast %55 : vector<1x128xf32> to vector<8x128xf32>
      %57 = arith.addf %54, %56 : vector<8x128xf32>
      %cst_29 = arith.constant 5.000000e-01 : f32
      %58 = vector.broadcast %cst_29 : f32 to vector<8x128xf32>
      %59 = arith.mulf %58, %57 : vector<8x128xf32>
      %cst_30 = arith.constant 0.707106769 : f32
      %60 = vector.broadcast %cst_30 : f32 to vector<8x128xf32>
      %61 = arith.mulf %57, %60 : vector<8x128xf32>
      %62 = math.erf %61 : vector<8x128xf32>
      %cst_31 = arith.constant 1.000000e+00 : f32
      %63 = vector.broadcast %cst_31 : f32 to vector<8x128xf32>
      %64 = arith.addf %63, %62 : vector<8x128xf32>
      %65 = arith.mulf %59, %64 : vector<8x128xf32>
      %c0_32 = arith.constant 0 : index
      %c0_33 = arith.constant 0 : index
      %66 = vector.load %arg17[%c0_32, %c0_33] : memref<128x32xf32, #tpu.memory_space<vmem>>, vector<128x32xf32>
      %cst_34 = arith.constant dense<0.000000e+00> : vector<8x32xf32>
      %67 = tpu.matmul %65, %66, %cst_34 {dimension_numbers = #tpu.dot_dimension_numbers<[1], [0], [0], [1], [0, 0, 1, 1], [], []>} : vector<8x128xf32>, vector<128x32xf32>, vector<8x32xf32> -> vector<8x32xf32>
      %c0_35 = arith.constant 0 : index
      %c0_36 = arith.constant 0 : index
      %68 = vector.load %arg18[%c0_35, %c0_36] : memref<1x32xf32, #tpu.memory_space<vmem>>, vector<1x32xf32>
      %69 = vector.broadcast %68 : vector<1x32xf32> to vector<8x32xf32>
      %70 = arith.addf %67, %69 : vector<8x32xf32>
      %71 = arith.addf %28, %70 : vector<8x32xf32>
      %c0_37 = arith.constant 0 : index
      %c0_38 = arith.constant 0 : index
      %c0_39 = arith.constant 0 : index
      %72 = vector.load %arg19[%c0_37, %c0_38, %c0_39] : memref<1x8x32xf32, #tpu.memory_space<vmem>>, vector<1x8x32xf32>
      %73 = vector.shape_cast %72 : vector<1x8x32xf32> to vector<8x32xf32>
      %74 = vector.shape_cast %71 : vector<8x32xf32> to vector<1x8x32xf32>
      tpu.vector_store %arg19[%c0_37, %c0_38, %c0_39], %74 {strides = array<i32>} : memref<1x8x32xf32, #tpu.memory_space<vmem>>, vector<1x8x32xf32>,
    } else {
    }
    return
  }
  func.func @transform_0(%arg0: i32, %arg1: i32, %arg2: i32, %arg3: i32) -> (i32, i32, i32) {
    %c0_i32 = arith.constant 0 : i32
    %c0_i32_0 = arith.constant 0 : i32
    return %arg0, %arg1, %c0_i32 : i32, i32, i32
  }
  func.func @transform_1(%arg0: i32, %arg1: i32, %arg2: i32, %arg3: i32) -> (i32, i32, i32) {
    %c0_i32 = arith.constant 0 : i32
    %c0_i32_0 = arith.constant 0 : i32
    return %arg0, %arg3, %c0_i32 : i32, i32, i32
  }
  func.func @transform_2(%arg0: i32, %arg1: i32, %arg2: i32, %arg3: i32) -> (i32, i32) {
    %c0_i32 = arith.constant 0 : i32
    %c0_i32_0 = arith.constant 0 : i32
    %c0_i32_1 = arith.constant 0 : i32
    return %c0_i32, %c0_i32_0 : i32, i32
  }
  func.func @transform_3(%arg0: i32, %arg1: i32, %arg2: i32, %arg3: i32) -> (i32, i32) {
    %c0_i32 = arith.constant 0 : i32
    %c0_i32_0 = arith.constant 0 : i32
    %c0_i32_1 = arith.constant 0 : i32
    return %c0_i32, %c0_i32_0 : i32, i32
  }
  func.func @transform_4(%arg0: i32, %arg1: i32, %arg2: i32, %arg3: i32) -> (i32, i32, i32) {
    %c0_i32 = arith.constant 0 : i32
    %c0_i32_0 = arith.constant 0 : i32
    %c0_i32_1 = arith.constant 0 : i32
    return %arg2, %c0_i32, %c0_i32_0 : i32, i32, i32
  }
  func.func @transform_5(%arg0: i32, %arg1: i32, %arg2: i32, %arg3: i32) -> (i32, i32, i32) {
    %c0_i32 = arith.constant 0 : i32
    %c0_i32_0 = arith.constant 0 : i32
    %c0_i32_1 = arith.constant 0 : i32
    return %arg2, %c0_i32, %c0_i32_0 : i32, i32, i32
  }
  func.func @transform_6(%arg0: i32, %arg1: i32, %arg2: i32, %arg3: i32) -> (i32, i32, i32) {
    %c0_i32 = arith.constant 0 : i32
    %c0_i32_0 = arith.constant 0 : i32
    %c0_i32_1 = arith.constant 0 : i32
    return %arg2, %c0_i32, %c0_i32_0 : i32, i32, i32
  }
  func.func @transform_7(%arg0: i32, %arg1: i32, %arg2: i32, %arg3: i32) -> (i32, i32, i32) {
    %c0_i32 = arith.constant 0 : i32
    %c0_i32_0 = arith.constant 0 : i32
    %c0_i32_1 = arith.constant 0 : i32
    return %arg2, %c0_i32, %c0_i32_0 : i32, i32, i32
  }
  func.func @transform_8(%arg0: i32, %arg1: i32, %arg2: i32, %arg3: i32) -> (i32, i32) {
    %c0_i32 = arith.constant 0 : i32
    %c0_i32_0 = arith.constant 0 : i32
    %c0_i32_1 = arith.constant 0 : i32
    return %c0_i32, %c0_i32_0 : i32, i32
  }
  func.func @transform_9(%arg0: i32, %arg1: i32, %arg2: i32, %arg3: i32) -> (i32, i32) {
    %c0_i32 = arith.constant 0 : i32
    %c0_i32_0 = arith.constant 0 : i32
    %c0_i32_1 = arith.constant 0 : i32
    return %c0_i32, %c0_i32_0 : i32, i32
  }
  func.func @transform_10(%arg0: i32, %arg1: i32, %arg2: i32, %arg3: i32) -> (i32, i32) {
    %c0_i32 = arith.constant 0 : i32
    %c0_i32_0 = arith.constant 0 : i32
    %c0_i32_1 = arith.constant 0 : i32
    return %c0_i32, %c0_i32_0 : i32, i32
  }
  func.func @transform_11(%arg0: i32, %arg1: i32, %arg2: i32, %arg3: i32) -> (i32, i32) {
    %c0_i32 = arith.constant 0 : i32
    %c0_i32_0 = arith.constant 0 : i32
    %c0_i32_1 = arith.constant 0 : i32
    return %c0_i32, %c0_i32_0 : i32, i32
  }
  func.func @transform_12(%arg0: i32, %arg1: i32, %arg2: i32, %arg3: i32) -> (i32, i32) {
    %c0_i32 = arith.constant 0 : i32
    %c0_i32_0 = arith.constant 0 : i32
    %c0_i32_1 = arith.constant 0 : i32
    return %c0_i32, %c0_i32_0 : i32, i32
  }
  func.func @transform_13(%arg0: i32, %arg1: i32, %arg2: i32, %arg3: i32) -> (i32, i32) {
    %c0_i32 = arith.constant 0 : i32
    %c0_i32_0 = arith.constant 0 : i32
    %c0_i32_1 = arith.constant 0 : i32
    return %c0_i32, %c0_i32_0 : i32, i32
  }
  func.func @transform_14(%arg0: i32, %arg1: i32, %arg2: i32, %arg3: i32) -> (i32, i32) {
    %c0_i32 = arith.constant 0 : i32
    %c0_i32_0 = arith.constant 0 : i32
    %c0_i32_1 = arith.constant 0 : i32
    return %c0_i32, %c0_i32_0 : i32, i32
  }
  func.func @transform_15(%arg0: i32, %arg1: i32, %arg2: i32, %arg3: i32) -> (i32, i32, i32) {
    %c0_i32 = arith.constant 0 : i32
    %c0_i32_0 = arith.constant 0 : i32
    return %arg0, %arg1, %c0_i32 : i32, i32, i32
  }
}

module attributes {stable_mosaic.version = 11 : i64} {
  func.func @_transformer_block_kernel(%arg0: i32, %arg1: i32, %arg2: i32, %arg3: i32, %arg4: memref<1x8x32xf32, #tpu.memory_space<vmem>>, %arg5: memref<1x8x32xf32, #tpu.memory_space<vmem>>, %arg6: memref<1x32xf32, #tpu.memory_space<vmem>>, %arg7: memref<1x32xf32, #tpu.memory_space<vmem>>, %arg8: memref<1x32x8xf32, #tpu.memory_space<vmem>>, %arg9: memref<1x32x8xf32, #tpu.memory_space<vmem>>, %arg10: memref<1x32x8xf32, #tpu.memory_space<vmem>>, %arg11: memref<1x8x32xf32, #tpu.memory_space<vmem>>, %arg12: memref<1x32xf32, #tpu.memory_space<vmem>>, %arg13: memref<1x32xf32, #tpu.memory_space<vmem>>, %arg14: memref<1x32xf32, #tpu.memory_space<vmem>>, %arg15: memref<32x128xf32, #tpu.memory_space<vmem>>, %arg16: memref<1x128xf32, #tpu.memory_space<vmem>>, %arg17: memref<128x32xf32, #tpu.memory_space<vmem>>, %arg18: memref<1x32xf32, #tpu.memory_space<vmem>>, %arg19: memref<1x8x32xf32, #tpu.memory_space<vmem>>, %arg20: memref<8x8xf32, #tpu.memory_space<vmem>>, %arg21: memref<8x1xf32, #tpu.memory_space<vmem>>, %arg22: memref<8x1xf32, #tpu.memory_space<vmem>>, %arg23: memref<8x8xf32, #tpu.memory_space<vmem>>, %arg24: memref<8x32xf32, #tpu.memory_space<vmem>>) attributes {dimension_semantics = [#tpu.dimension_semantics<parallel>, #tpu.dimension_semantics<parallel>, #tpu.dimension_semantics<arbitrary>, #tpu.dimension_semantics<arbitrary>], iteration_bounds = array<i64: 2, 2, 4, 2>, scalar_prefetch = 0 : i64, scratch_operands = 5 : i64, tpu.core_type = #tpu.core_type<tc>, window_params = [{transform_indices = @transform_0, window_bounds = array<i64: 1, 8, 32>}, {transform_indices = @transform_1, window_bounds = array<i64: 1, 8, 32>}, {pipeline_mode = #tpu.pipeline_mode<synchronous>, transform_indices = @transform_2, window_bounds = array<i64: 1, 32>}, {pipeline_mode = #tpu.pipeline_mode<synchronous>, transform_indices = @transform_3, window_bounds = array<i64: 1, 32>}, {transform_indices = @transform_4, window_bounds = array<i64: 1, 32, 8>}, {transform_indices = @transform_5, window_bounds = array<i64: 1, 32, 8>}, {transform_indices = @transform_6, window_bounds = array<i64: 1, 32, 8>}, {transform_indices = @transform_7, window_bounds = array<i64: 1, 8, 32>}, {pipeline_mode = #tpu.pipeline_mode<synchronous>, transform_indices = @transform_8, window_bounds = array<i64: 1, 32>}, {pipeline_mode = #tpu.pipeline_mode<synchronous>, transform_indices = @transform_9, window_bounds = array<i64: 1, 32>}, {pipeline_mode = #tpu.pipeline_mode<synchronous>, transform_indices = @transform_10, window_bounds = array<i64: 1, 32>}, {pipeline_mode = #tpu.pipeline_mode<synchronous>, transform_indices = @transform_11, window_bounds = array<i64: 32, 128>}, {pipeline_mode = #tpu.pipeline_mode<synchronous>, transform_indices = @transform_12, window_bounds = array<i64: 1, 128>}, {pipeline_mode = #tpu.pipeline_mode<synchronous>, transform_indices = @transform_13, window_bounds = array<i64: 128, 32>}, {pipeline_mode = #tpu.pipeline_mode<synchronous>, transform_indices = @transform_14, window_bounds = array<i64: 1, 32>}, {transform_indices = @transform_15, window_bounds = array<i64: 1, 8, 32>}]} {
    %c0_i32 = arith.constant 0 : i32
    %0 = arith.cmpi eq, %arg2, %c0_i32 : i32
    %c0_i32_0 = arith.constant 0 : i32
    %1 = arith.cmpi eq, %arg3, %c0_i32_0 : i32
    %2 = arith.andi %0, %1 : i1
    %3 = arith.extui %2 : i1 to i32
    %c0_i32_1 = arith.constant 0 : i32
    %4 = arith.cmpi ne, %3, %c0_i32_1 : i32
    scf.if %4 {
      %cst = arith.constant 0.000000e+00 : f32
      %22 = vector.broadcast %cst : f32 to vector<8x32xf32>
      %c0 = arith.constant 0 : index
      %c0_10 = arith.constant 0 : index
      %23 = vector.load %arg24[%c0, %c0_10] : memref<8x32xf32, #tpu.memory_space<vmem>>, vector<8x32xf32>
      tpu.vector_store %arg24[%c0, %c0_10], %22 {strides = array<i32>} : memref<8x32xf32, #tpu.memory_space<vmem>>, vector<8x32xf32>,
    } else {
    }
    %c0_i32_2 = arith.constant 0 : i32
    %5 = arith.cmpi eq, %arg3, %c0_i32_2 : i32
    %6 = arith.extui %5 : i1 to i32
    %c0_i32_3 = arith.constant 0 : i32
    %7 = arith.cmpi ne, %6, %c0_i32_3 : i32
    scf.if %7 {
      %c0 = arith.constant 0 : index
      %c0_10 = arith.constant 0 : index
      %c0_11 = arith.constant 0 : index
      %22 = vector.load %arg4[%c0, %c0_10, %c0_11] : memref<1x8x32xf32, #tpu.memory_space<vmem>>, vector<1x8x32xf32>
      %23 = vector.shape_cast %22 : vector<1x8x32xf32> to vector<8x32xf32>
      %c0_12 = arith.constant 0 : index
      %c0_13 = arith.constant 0 : index
      %24 = vector.load %arg6[%c0_12, %c0_13] : memref<1x32xf32, #tpu.memory_space<vmem>>, vector<1x32xf32>
      %c0_14 = arith.constant 0 : index
      %c0_15 = arith.constant 0 : index
      %25 = vector.load %arg7[%c0_14, %c0_15] : memref<1x32xf32, #tpu.memory_space<vmem>>, vector<1x32xf32>
      %cst = arith.constant dense<0.000000e+00> : vector<8xf32>
      %26 = vector.multi_reduction <add>, %23, %cst [1] : vector<8x32xf32> to vector<8xf32>
      %27 = vector.shape_cast %26 : vector<8xf32> to vector<8x1xf32>
      %cst_16 = arith.constant 3.200000e+01 : f32
      %28 = vector.broadcast %cst_16 : f32 to vector<8x1xf32>
      %29 = arith.divf %27, %28 : vector<8x1xf32>
      %30 = vector.broadcast %29 : vector<8x1xf32> to vector<8x32xf32>
      %31 = arith.subf %23, %30 : vector<8x32xf32>
      %32 = arith.mulf %31, %31 : vector<8x32xf32>
      %cst_17 = arith.constant dense<0.000000e+00> : vector<8xf32>
      %33 = vector.multi_reduction <add>, %32, %cst_17 [1] : vector<8x32xf32> to vector<8xf32>
      %34 = vector.shape_cast %33 : vector<8xf32> to vector<8x1xf32>
      %cst_18 = arith.constant 3.200000e+01 : f32
      %35 = vector.broadcast %cst_18 : f32 to vector<8x1xf32>
      %36 = arith.divf %34, %35 : vector<8x1xf32>
      %37 = vector.broadcast %29 : vector<8x1xf32> to vector<8x32xf32>
      %38 = arith.subf %23, %37 : vector<8x32xf32>
      %cst_19 = arith.constant 9.99999974E-6 : f32
      %39 = vector.broadcast %cst_19 : f32 to vector<8x1xf32>
      %40 = arith.addf %36, %39 : vector<8x1xf32>
      %41 = math.rsqrt %40 : vector<8x1xf32>
      %42 = vector.broadcast %41 : vector<8x1xf32> to vector<8x32xf32>
      %43 = arith.mulf %38, %42 : vector<8x32xf32>
      %44 = vector.broadcast %24 : vector<1x32xf32> to vector<8x32xf32>
      %45 = arith.mulf %43, %44 : vector<8x32xf32>
      %46 = vector.broadcast %25 : vector<1x32xf32> to vector<8x32xf32>
      %47 = arith.addf %45, %46 : vector<8x32xf32>
      %c0_20 = arith.constant 0 : index
      %c0_21 = arith.constant 0 : index
      %c0_22 = arith.constant 0 : index
      %48 = vector.load %arg8[%c0_20, %c0_21, %c0_22] : memref<1x32x8xf32, #tpu.memory_space<vmem>>, vector<1x32x8xf32>
      %49 = vector.shape_cast %48 : vector<1x32x8xf32> to vector<32x8xf32>
      %cst_23 = arith.constant dense<0.000000e+00> : vector<8x8xf32>
      %50 = tpu.matmul %47, %49, %cst_23 {dimension_numbers = #tpu.dot_dimension_numbers<[1], [0], [0], [1], [0, 0, 1, 1], [], []>} : vector<8x32xf32>, vector<32x8xf32>, vector<8x8xf32> -> vector<8x8xf32>
      %cst_24 = arith.constant 0.353553385 : f32
      %51 = vector.broadcast %cst_24 : f32 to vector<8x8xf32>
      %52 = arith.mulf %50, %51 : vector<8x8xf32>
      %c0_25 = arith.constant 0 : index
      %c0_26 = arith.constant 0 : index
      %53 = vector.load %arg20[%c0_25, %c0_26] : memref<8x8xf32, #tpu.memory_space<vmem>>, vector<8x8xf32>
      tpu.vector_store %arg20[%c0_25, %c0_26], %52 {strides = array<i32>} : memref<8x8xf32, #tpu.memory_space<vmem>>, vector<8x8xf32>,
      %cst_27 = arith.constant -1.000000e+30 : f32
      %54 = vector.broadcast %cst_27 : f32 to vector<8x1xf32>
      %c0_28 = arith.constant 0 : index
      %c0_29 = arith.constant 0 : index
      %55 = vector.load %arg21[%c0_28, %c0_29] : memref<8x1xf32, #tpu.memory_space<vmem>>, vector<8x1xf32>
      tpu.vector_store %arg21[%c0_28, %c0_29], %54 {strides = array<i32>} : memref<8x1xf32, #tpu.memory_space<vmem>>, vector<8x1xf32>,
      %cst_30 = arith.constant 0.000000e+00 : f32
      %56 = vector.broadcast %cst_30 : f32 to vector<8x1xf32>
      %c0_31 = arith.constant 0 : index
      %c0_32 = arith.constant 0 : index
      %57 = vector.load %arg22[%c0_31, %c0_32] : memref<8x1xf32, #tpu.memory_space<vmem>>, vector<8x1xf32>
      tpu.vector_store %arg22[%c0_31, %c0_32], %56 {strides = array<i32>} : memref<8x1xf32, #tpu.memory_space<vmem>>, vector<8x1xf32>,
      %cst_33 = arith.constant 0.000000e+00 : f32
      %58 = vector.broadcast %cst_33 : f32 to vector<8x8xf32>
      %c0_34 = arith.constant 0 : index
      %c0_35 = arith.constant 0 : index
      %59 = vector.load %arg23[%c0_34, %c0_35] : memref<8x8xf32, #tpu.memory_space<vmem>>, vector<8x8xf32>
      tpu.vector_store %arg23[%c0_34, %c0_35], %58 {strides = array<i32>} : memref<8x8xf32, #tpu.memory_space<vmem>>, vector<8x8xf32>,
    } else {
    }
    %c8_i32 = arith.constant 8 : i32
    %8 = arith.muli %arg3, %c8_i32 : i32
    %c1_i32 = arith.constant 1 : i32
    %9 = arith.addi %arg1, %c1_i32 : i32
    %c8_i32_4 = arith.constant 8 : i32
    %10 = arith.muli %9, %c8_i32_4 : i32
    %11 = arith.cmpi slt, %8, %10 : i32
    %12 = arith.extui %11 : i1 to i32
    %c0_i32_5 = arith.constant 0 : i32
    %13 = arith.cmpi ne, %12, %c0_i32_5 : i32
    scf.if %13 {
      %c0 = arith.constant 0 : index
      %c0_10 = arith.constant 0 : index
      %c0_11 = arith.constant 0 : index
      %22 = vector.load %arg5[%c0, %c0_10, %c0_11] : memref<1x8x32xf32, #tpu.memory_space<vmem>>, vector<1x8x32xf32>
      %23 = vector.shape_cast %22 : vector<1x8x32xf32> to vector<8x32xf32>
      %c0_12 = arith.constant 0 : index
      %c0_13 = arith.constant 0 : index
      %24 = vector.load %arg6[%c0_12, %c0_13] : memref<1x32xf32, #tpu.memory_space<vmem>>, vector<1x32xf32>
      %c0_14 = arith.constant 0 : index
      %c0_15 = arith.constant 0 : index
      %25 = vector.load %arg7[%c0_14, %c0_15] : memref<1x32xf32, #tpu.memory_space<vmem>>, vector<1x32xf32>
      %cst = arith.constant dense<0.000000e+00> : vector<8xf32>
      %26 = vector.multi_reduction <add>, %23, %cst [1] : vector<8x32xf32> to vector<8xf32>
      %27 = vector.shape_cast %26 : vector<8xf32> to vector<8x1xf32>
      %cst_16 = arith.constant 3.200000e+01 : f32
      %28 = vector.broadcast %cst_16 : f32 to vector<8x1xf32>
      %29 = arith.divf %27, %28 : vector<8x1xf32>
      %30 = vector.broadcast %29 : vector<8x1xf32> to vector<8x32xf32>
      %31 = arith.subf %23, %30 : vector<8x32xf32>
      %32 = arith.mulf %31, %31 : vector<8x32xf32>
      %cst_17 = arith.constant dense<0.000000e+00> : vector<8xf32>
      %33 = vector.multi_reduction <add>, %32, %cst_17 [1] : vector<8x32xf32> to vector<8xf32>
      %34 = vector.shape_cast %33 : vector<8xf32> to vector<8x1xf32>
      %cst_18 = arith.constant 3.200000e+01 : f32
      %35 = vector.broadcast %cst_18 : f32 to vector<8x1xf32>
      %36 = arith.divf %34, %35 : vector<8x1xf32>
      %37 = vector.broadcast %29 : vector<8x1xf32> to vector<8x32xf32>
      %38 = arith.subf %23, %37 : vector<8x32xf32>
      %cst_19 = arith.constant 9.99999974E-6 : f32
      %39 = vector.broadcast %cst_19 : f32 to vector<8x1xf32>
      %40 = arith.addf %36, %39 : vector<8x1xf32>
      %41 = math.rsqrt %40 : vector<8x1xf32>
      %42 = vector.broadcast %41 : vector<8x1xf32> to vector<8x32xf32>
      %43 = arith.mulf %38, %42 : vector<8x32xf32>
      %44 = vector.broadcast %24 : vector<1x32xf32> to vector<8x32xf32>
      %45 = arith.mulf %43, %44 : vector<8x32xf32>
      %46 = vector.broadcast %25 : vector<1x32xf32> to vector<8x32xf32>
      %47 = arith.addf %45, %46 : vector<8x32xf32>
      %c0_20 = arith.constant 0 : index
      %c0_21 = arith.constant 0 : index
      %c0_22 = arith.constant 0 : index
      %48 = vector.load %arg9[%c0_20, %c0_21, %c0_22] : memref<1x32x8xf32, #tpu.memory_space<vmem>>, vector<1x32x8xf32>
      %49 = vector.shape_cast %48 : vector<1x32x8xf32> to vector<32x8xf32>
      %cst_23 = arith.constant dense<0.000000e+00> : vector<8x8xf32>
      %50 = tpu.matmul %47, %49, %cst_23 {dimension_numbers = #tpu.dot_dimension_numbers<[1], [0], [0], [1], [0, 0, 1, 1], [], []>} : vector<8x32xf32>, vector<32x8xf32>, vector<8x8xf32> -> vector<8x8xf32>
      %c0_24 = arith.constant 0 : index
      %c0_25 = arith.constant 0 : index
      %c0_26 = arith.constant 0 : index
      %51 = vector.load %arg10[%c0_24, %c0_25, %c0_26] : memref<1x32x8xf32, #tpu.memory_space<vmem>>, vector<1x32x8xf32>
      %52 = vector.shape_cast %51 : vector<1x32x8xf32> to vector<32x8xf32>
      %cst_27 = arith.constant dense<0.000000e+00> : vector<8x8xf32>
      %53 = tpu.matmul %47, %52, %cst_27 {dimension_numbers = #tpu.dot_dimension_numbers<[1], [0], [0], [1], [0, 0, 1, 1], [], []>} : vector<8x32xf32>, vector<32x8xf32>, vector<8x8xf32> -> vector<8x8xf32>
      %c0_28 = arith.constant 0 : index
      %c0_29 = arith.constant 0 : index
      %54 = vector.load %arg20[%c0_28, %c0_29] : memref<8x8xf32, #tpu.memory_space<vmem>>, vector<8x8xf32>
      %cst_30 = arith.constant dense<0.000000e+00> : vector<8x8xf32>
      %55 = tpu.matmul %54, %50, %cst_30 {dimension_numbers = #tpu.dot_dimension_numbers<[1], [1], [0], [0], [0, 0, 1, 0], [], []>} : vector<8x8xf32>, vector<8x8xf32>, vector<8x8xf32> -> vector<8x8xf32>
      %c8_i32_31 = arith.constant 8 : i32
      %56 = arith.muli %arg1, %c8_i32_31 : i32
      %57 = tpu.iota {dimensions = array<i32: 0>} : vector<8x8xi32>
      %58 = vector.broadcast %56 : i32 to vector<8x8xi32>
      %59 = arith.addi %58, %57 : vector<8x8xi32>
      %c8_i32_32 = arith.constant 8 : i32
      %60 = arith.muli %arg3, %c8_i32_32 : i32
      %61 = tpu.iota {dimensions = array<i32: 1>} : vector<8x8xi32>
      %62 = vector.broadcast %60 : i32 to vector<8x8xi32>
      %63 = arith.addi %62, %61 : vector<8x8xi32>
      %64 = arith.cmpi sge, %59, %63 : vector<8x8xi32>
      %cst_33 = arith.constant -1.000000e+30 : f32
      %65 = vector.broadcast %cst_33 : f32 to vector<8x8xf32>
      %66 = arith.select %64, %55, %65 : vector<8x8xi1>, vector<8x8xf32>
      %c0_34 = arith.constant 0 : index
      %c0_35 = arith.constant 0 : index
      %67 = vector.load %arg21[%c0_34, %c0_35] : memref<8x1xf32, #tpu.memory_space<vmem>>, vector<8x1xf32>
      %cst_36 = arith.constant dense<0xFF800000> : vector<8xf32>
      %68 = vector.multi_reduction <maximumf>, %66, %cst_36 [1] : vector<8x8xf32> to vector<8xf32>
      %69 = vector.shape_cast %68 : vector<8xf32> to vector<8x1xf32>
      %70 = arith.maximumf %67, %69 : vector<8x1xf32>
      %71 = arith.subf %67, %70 : vector<8x1xf32>
      %72 = math.exp %71 : vector<8x1xf32>
      %73 = vector.broadcast %70 : vector<8x1xf32> to vector<8x8xf32>
      %74 = arith.subf %66, %73 : vector<8x8xf32>
      %75 = math.exp %74 : vector<8x8xf32>
      %c0_37 = arith.constant 0 : index
      %c0_38 = arith.constant 0 : index
      %76 = vector.load %arg22[%c0_37, %c0_38] : memref<8x1xf32, #tpu.memory_space<vmem>>, vector<8x1xf32>
      %77 = arith.mulf %72, %76 : vector<8x1xf32>
      %cst_39 = arith.constant dense<0.000000e+00> : vector<8xf32>
      %78 = vector.multi_reduction <add>, %75, %cst_39 [1] : vector<8x8xf32> to vector<8xf32>
      %79 = vector.shape_cast %78 : vector<8xf32> to vector<8x1xf32>
      %80 = arith.addf %77, %79 : vector<8x1xf32>
      %c0_40 = arith.constant 0 : index
      %c0_41 = arith.constant 0 : index
      %81 = vector.load %arg22[%c0_40, %c0_41] : memref<8x1xf32, #tpu.memory_space<vmem>>, vector<8x1xf32>
      tpu.vector_store %arg22[%c0_40, %c0_41], %80 {strides = array<i32>} : memref<8x1xf32, #tpu.memory_space<vmem>>, vector<8x1xf32>,
      %c0_42 = arith.constant 0 : index
      %c0_43 = arith.constant 0 : index
      %82 = vector.load %arg23[%c0_42, %c0_43] : memref<8x8xf32, #tpu.memory_space<vmem>>, vector<8x8xf32>
      %83 = vector.broadcast %72 : vector<8x1xf32> to vector<8x8xf32>
      %84 = arith.mulf %83, %82 : vector<8x8xf32>
      %cst_44 = arith.constant dense<0.000000e+00> : vector<8x8xf32>
      %85 = tpu.matmul %75, %53, %cst_44 {dimension_numbers = #tpu.dot_dimension_numbers<[1], [0], [0], [1], [0, 0, 1, 1], [], []>} : vector<8x8xf32>, vector<8x8xf32>, vector<8x8xf32> -> vector<8x8xf32>
      %86 = arith.addf %84, %85 : vector<8x8xf32>
      %c0_45 = arith.constant 0 : index
      %c0_46 = arith.constant 0 : index
      %87 = vector.load %arg23[%c0_45, %c0_46] : memref<8x8xf32, #tpu.memory_space<vmem>>, vector<8x8xf32>
      tpu.vector_store %arg23[%c0_45, %c0_46], %86 {strides = array<i32>} : memref<8x8xf32, #tpu.memory_space<vmem>>, vector<8x8xf32>,
      %c0_47 = arith.constant 0 : index
      %c0_48 = arith.constant 0 : index
      %88 = vector.load %arg21[%c0_47, %c0_48] : memref<8x1xf32, #tpu.memory_space<vmem>>, vector<8x1xf32>
      tpu.vector_store %arg21[%c0_47, %c0_48], %70 {strides = array<i32>} : memref<8x1xf32, #tpu.memory_space<vmem>>, vector<8x1xf32>,
    } else {
    }
    %c1_i32_6 = arith.constant 1 : i32
    %14 = arith.cmpi eq, %arg3, %c1_i32_6 : i32
    %15 = arith.extui %14 : i1 to i32
    %c0_i32_7 = arith.constant 0 : i32
    %16 = arith.cmpi ne, %15, %c0_i32_7 : i32
    scf.if %16 {
      %c0 = arith.constant 0 : index
      %c0_10 = arith.constant 0 : index
      %22 = vector.load %arg23[%c0, %c0_10] : memref<8x8xf32, #tpu.memory_space<vmem>>, vector<8x8xf32>
      %c0_11 = arith.constant 0 : index
      %c0_12 = arith.constant 0 : index
      %23 = vector.load %arg22[%c0_11, %c0_12] : memref<8x1xf32, #tpu.memory_space<vmem>>, vector<8x1xf32>
      %24 = tpu.reciprocal %23 {approx = true} : vector<8x1xf32> -> vector<8x1xf32>
      %25 = vector.broadcast %24 : vector<8x1xf32> to vector<8x8xf32>
      %26 = arith.mulf %22, %25 : vector<8x8xf32>
      %c0_13 = arith.constant 0 : index
      %c0_14 = arith.constant 0 : index
      %27 = vector.load %arg24[%c0_13, %c0_14] : memref<8x32xf32, #tpu.memory_space<vmem>>, vector<8x32xf32>
      %c0_15 = arith.constant 0 : index
      %c0_16 = arith.constant 0 : index
      %c0_17 = arith.constant 0 : index
      %28 = vector.load %arg11[%c0_15, %c0_16, %c0_17] : memref<1x8x32xf32, #tpu.memory_space<vmem>>, vector<1x8x32xf32>
      %29 = vector.shape_cast %28 : vector<1x8x32xf32> to vector<8x32xf32>
      %cst = arith.constant dense<0.000000e+00> : vector<8x32xf32>
      %30 = tpu.matmul %26, %29, %cst {dimension_numbers = #tpu.dot_dimension_numbers<[1], [0], [0], [1], [0, 0, 1, 1], [], []>} : vector<8x8xf32>, vector<8x32xf32>, vector<8x32xf32> -> vector<8x32xf32>
      %31 = arith.addf %27, %30 : vector<8x32xf32>
      %c0_18 = arith.constant 0 : index
      %c0_19 = arith.constant 0 : index
      %32 = vector.load %arg24[%c0_18, %c0_19] : memref<8x32xf32, #tpu.memory_space<vmem>>, vector<8x32xf32>
      tpu.vector_store %arg24[%c0_18, %c0_19], %31 {strides = array<i32>} : memref<8x32xf32, #tpu.memory_space<vmem>>, vector<8x32xf32>,
    } else {
    }
    %c3_i32 = arith.constant 3 : i32
    %17 = arith.cmpi eq, %arg2, %c3_i32 : i32
    %c1_i32_8 = arith.constant 1 : i32
    %18 = arith.cmpi eq, %arg3, %c1_i32_8 : i32
    %19 = arith.andi %17, %18 : i1
    %20 = arith.extui %19 : i1 to i32
    %c0_i32_9 = arith.constant 0 : i32
    %21 = arith.cmpi ne, %20, %c0_i32_9 : i32
    scf.if %21 {
      %c0 = arith.constant 0 : index
      %c0_10 = arith.constant 0 : index
      %c0_11 = arith.constant 0 : index
      %22 = vector.load %arg4[%c0, %c0_10, %c0_11] : memref<1x8x32xf32, #tpu.memory_space<vmem>>, vector<1x8x32xf32>
      %23 = vector.shape_cast %22 : vector<1x8x32xf32> to vector<8x32xf32>
      %c0_12 = arith.constant 0 : index
      %c0_13 = arith.constant 0 : index
      %24 = vector.load %arg24[%c0_12, %c0_13] : memref<8x32xf32, #tpu.memory_space<vmem>>, vector<8x32xf32>
      %25 = arith.addf %23, %24 : vector<8x32xf32>
      %c0_14 = arith.constant 0 : index
      %c0_15 = arith.constant 0 : index
      %26 = vector.load %arg12[%c0_14, %c0_15] : memref<1x32xf32, #tpu.memory_space<vmem>>, vector<1x32xf32>
      %27 = vector.broadcast %26 : vector<1x32xf32> to vector<8x32xf32>
      %28 = arith.addf %25, %27 : vector<8x32xf32>
      %c0_16 = arith.constant 0 : index
      %c0_17 = arith.constant 0 : index
      %29 = vector.load %arg13[%c0_16, %c0_17] : memref<1x32xf32, #tpu.memory_space<vmem>>, vector<1x32xf32>
      %c0_18 = arith.constant 0 : index
      %c0_19 = arith.constant 0 : index
      %30 = vector.load %arg14[%c0_18, %c0_19] : memref<1x32xf32, #tpu.memory_space<vmem>>, vector<1x32xf32>
      %cst = arith.constant dense<0.000000e+00> : vector<8xf32>
      %31 = vector.multi_reduction <add>, %28, %cst [1] : vector<8x32xf32> to vector<8xf32>
      %32 = vector.shape_cast %31 : vector<8xf32> to vector<8x1xf32>
      %cst_20 = arith.constant 3.200000e+01 : f32
      %33 = vector.broadcast %cst_20 : f32 to vector<8x1xf32>
      %34 = arith.divf %32, %33 : vector<8x1xf32>
      %35 = vector.broadcast %34 : vector<8x1xf32> to vector<8x32xf32>
      %36 = arith.subf %28, %35 : vector<8x32xf32>
      %37 = arith.mulf %36, %36 : vector<8x32xf32>
      %cst_21 = arith.constant dense<0.000000e+00> : vector<8xf32>
      %38 = vector.multi_reduction <add>, %37, %cst_21 [1] : vector<8x32xf32> to vector<8xf32>
      %39 = vector.shape_cast %38 : vector<8xf32> to vector<8x1xf32>
      %cst_22 = arith.constant 3.200000e+01 : f32
      %40 = vector.broadcast %cst_22 : f32 to vector<8x1xf32>
      %41 = arith.divf %39, %40 : vector<8x1xf32>
      %42 = vector.broadcast %34 : vector<8x1xf32> to vector<8x32xf32>
      %43 = arith.subf %28, %42 : vector<8x32xf32>
      %cst_23 = arith.constant 9.99999974E-6 : f32
      %44 = vector.broadcast %cst_23 : f32 to vector<8x1xf32>
      %45 = arith.addf %41, %44 : vector<8x1xf32>
      %46 = math.rsqrt %45 : vector<8x1xf32>
      %47 = vector.broadcast %46 : vector<8x1xf32> to vector<8x32xf32>
      %48 = arith.mulf %43, %47 : vector<8x32xf32>
      %49 = vector.broadcast %29 : vector<1x32xf32> to vector<8x32xf32>
      %50 = arith.mulf %48, %49 : vector<8x32xf32>
      %51 = vector.broadcast %30 : vector<1x32xf32> to vector<8x32xf32>
      %52 = arith.addf %50, %51 : vector<8x32xf32>
      %c0_24 = arith.constant 0 : index
      %c0_25 = arith.constant 0 : index
      %53 = vector.load %arg15[%c0_24, %c0_25] : memref<32x128xf32, #tpu.memory_space<vmem>>, vector<32x128xf32>
      %cst_26 = arith.constant dense<0.000000e+00> : vector<8x128xf32>
      %54 = tpu.matmul %52, %53, %cst_26 {dimension_numbers = #tpu.dot_dimension_numbers<[1], [0], [0], [1], [0, 0, 1, 1], [], []>} : vector<8x32xf32>, vector<32x128xf32>, vector<8x128xf32> -> vector<8x128xf32>
      %c0_27 = arith.constant 0 : index
      %c0_28 = arith.constant 0 : index
      %55 = vector.load %arg16[%c0_27, %c0_28] : memref<1x128xf32, #tpu.memory_space<vmem>>, vector<1x128xf32>
      %56 = vector.broadcast %55 : vector<1x128xf32> to vector<8x128xf32>
      %57 = arith.addf %54, %56 : vector<8x128xf32>
      %cst_29 = arith.constant 5.000000e-01 : f32
      %58 = vector.broadcast %cst_29 : f32 to vector<8x128xf32>
      %59 = arith.mulf %58, %57 : vector<8x128xf32>
      %cst_30 = arith.constant 0.707106769 : f32
      %60 = vector.broadcast %cst_30 : f32 to vector<8x128xf32>
      %61 = arith.mulf %57, %60 : vector<8x128xf32>
      %62 = math.erf %61 : vector<8x128xf32>
      %cst_31 = arith.constant 1.000000e+00 : f32
      %63 = vector.broadcast %cst_31 : f32 to vector<8x128xf32>
      %64 = arith.addf %63, %62 : vector<8x128xf32>
      %65 = arith.mulf %59, %64 : vector<8x128xf32>
      %c0_32 = arith.constant 0 : index
      %c0_33 = arith.constant 0 : index
      %66 = vector.load %arg17[%c0_32, %c0_33] : memref<128x32xf32, #tpu.memory_space<vmem>>, vector<128x32xf32>
      %cst_34 = arith.constant dense<0.000000e+00> : vector<8x32xf32>
      %67 = tpu.matmul %65, %66, %cst_34 {dimension_numbers = #tpu.dot_dimension_numbers<[1], [0], [0], [1], [0, 0, 1, 1], [], []>} : vector<8x128xf32>, vector<128x32xf32>, vector<8x32xf32> -> vector<8x32xf32>
      %c0_35 = arith.constant 0 : index
      %c0_36 = arith.constant 0 : index
      %68 = vector.load %arg18[%c0_35, %c0_36] : memref<1x32xf32, #tpu.memory_space<vmem>>, vector<1x32xf32>
      %69 = vector.broadcast %68 : vector<1x32xf32> to vector<8x32xf32>
      %70 = arith.addf %67, %69 : vector<8x32xf32>
      %71 = arith.addf %28, %70 : vector<8x32xf32>
      %c0_37 = arith.constant 0 : index
      %c0_38 = arith.constant 0 : index
      %c0_39 = arith.constant 0 : index
      %72 = vector.load %arg19[%c0_37, %c0_38, %c0_39] : memref<1x8x32xf32, #tpu.memory_space<vmem>>, vector<1x8x32xf32>
      %73 = vector.shape_cast %72 : vector<1x8x32xf32> to vector<8x32xf32>
      %74 = vector.shape_cast %71 : vector<8x32xf32> to vector<1x8x32xf32>
      tpu.vector_store %arg19[%c0_37, %c0_38, %c0_39], %74 {strides = array<i32>} : memref<1x8x32xf32, #tpu.memory_space<vmem>>, vector<1x8x32xf32>,
    } else {
    }
    return
  }
  func.func @transform_0(%arg0: i32, %arg1: i32, %arg2: i32, %arg3: i32) -> (i32, i32, i32) {
    %c0_i32 = arith.constant 0 : i32
    %c0_i32_0 = arith.constant 0 : i32
    return %arg0, %arg1, %c0_i32 : i32, i32, i32
  }
  func.func @transform_1(%arg0: i32, %arg1: i32, %arg2: i32, %arg3: i32) -> (i32, i32, i32) {
    %c0_i32 = arith.constant 0 : i32
    %c0_i32_0 = arith.constant 0 : i32
    return %arg0, %arg3, %c0_i32 : i32, i32, i32
  }
  func.func @transform_2(%arg0: i32, %arg1: i32, %arg2: i32, %arg3: i32) -> (i32, i32) {
    %c0_i32 = arith.constant 0 : i32
    %c0_i32_0 = arith.constant 0 : i32
    %c0_i32_1 = arith.constant 0 : i32
    return %c0_i32, %c0_i32_0 : i32, i32
  }
  func.func @transform_3(%arg0: i32, %arg1: i32, %arg2: i32, %arg3: i32) -> (i32, i32) {
    %c0_i32 = arith.constant 0 : i32
    %c0_i32_0 = arith.constant 0 : i32
    %c0_i32_1 = arith.constant 0 : i32
    return %c0_i32, %c0_i32_0 : i32, i32
  }
  func.func @transform_4(%arg0: i32, %arg1: i32, %arg2: i32, %arg3: i32) -> (i32, i32, i32) {
    %c0_i32 = arith.constant 0 : i32
    %c0_i32_0 = arith.constant 0 : i32
    %c0_i32_1 = arith.constant 0 : i32
    return %arg2, %c0_i32, %c0_i32_0 : i32, i32, i32
  }
  func.func @transform_5(%arg0: i32, %arg1: i32, %arg2: i32, %arg3: i32) -> (i32, i32, i32) {
    %c0_i32 = arith.constant 0 : i32
    %c0_i32_0 = arith.constant 0 : i32
    %c0_i32_1 = arith.constant 0 : i32
    return %arg2, %c0_i32, %c0_i32_0 : i32, i32, i32
  }
  func.func @transform_6(%arg0: i32, %arg1: i32, %arg2: i32, %arg3: i32) -> (i32, i32, i32) {
    %c0_i32 = arith.constant 0 : i32
    %c0_i32_0 = arith.constant 0 : i32
    %c0_i32_1 = arith.constant 0 : i32
    return %arg2, %c0_i32, %c0_i32_0 : i32, i32, i32
  }
  func.func @transform_7(%arg0: i32, %arg1: i32, %arg2: i32, %arg3: i32) -> (i32, i32, i32) {
    %c0_i32 = arith.constant 0 : i32
    %c0_i32_0 = arith.constant 0 : i32
    %c0_i32_1 = arith.constant 0 : i32
    return %arg2, %c0_i32, %c0_i32_0 : i32, i32, i32
  }
  func.func @transform_8(%arg0: i32, %arg1: i32, %arg2: i32, %arg3: i32) -> (i32, i32) {
    %c0_i32 = arith.constant 0 : i32
    %c0_i32_0 = arith.constant 0 : i32
    %c0_i32_1 = arith.constant 0 : i32
    return %c0_i32, %c0_i32_0 : i32, i32
  }
  func.func @transform_9(%arg0: i32, %arg1: i32, %arg2: i32, %arg3: i32) -> (i32, i32) {
    %c0_i32 = arith.constant 0 : i32
    %c0_i32_0 = arith.constant 0 : i32
    %c0_i32_1 = arith.constant 0 : i32
    return %c0_i32, %c0_i32_0 : i32, i32
  }
  func.func @transform_10(%arg0: i32, %arg1: i32, %arg2: i32, %arg3: i32) -> (i32, i32) {
    %c0_i32 = arith.constant 0 : i32
    %c0_i32_0 = arith.constant 0 : i32
    %c0_i32_1 = arith.constant 0 : i32
    return %c0_i32, %c0_i32_0 : i32, i32
  }
  func.func @transform_11(%arg0: i32, %arg1: i32, %arg2: i32, %arg3: i32) -> (i32, i32) {
    %c0_i32 = arith.constant 0 : i32
    %c0_i32_0 = arith.constant 0 : i32
    %c0_i32_1 = arith.constant 0 : i32
    return %c0_i32, %c0_i32_0 : i32, i32
  }
  func.func @transform_12(%arg0: i32, %arg1: i32, %arg2: i32, %arg3: i32) -> (i32, i32) {
    %c0_i32 = arith.constant 0 : i32
    %c0_i32_0 = arith.constant 0 : i32
    %c0_i32_1 = arith.constant 0 : i32
    return %c0_i32, %c0_i32_0 : i32, i32
  }
  func.func @transform_13(%arg0: i32, %arg1: i32, %arg2: i32, %arg3: i32) -> (i32, i32) {
    %c0_i32 = arith.constant 0 : i32
    %c0_i32_0 = arith.constant 0 : i32
    %c0_i32_1 = arith.constant 0 : i32
    return %c0_i32, %c0_i32_0 : i32, i32
  }
  func.func @transform_14(%arg0: i32, %arg1: i32, %arg2: i32, %arg3: i32) -> (i32, i32) {
    %c0_i32 = arith.constant 0 : i32
    %c0_i32_0 = arith.constant 0 : i32
    %c0_i32_1 = arith.constant 0 : i32
    return %c0_i32, %c0_i32_0 : i32, i32
  }
  func.func @transform_15(%arg0: i32, %arg1: i32, %arg2: i32, %arg3: i32) -> (i32, i32, i32) {
    %c0_i32 = arith.constant 0 : i32
    %c0_i32_0 = arith.constant 0 : i32
    return %arg0, %arg1, %c0_i32 : i32, i32, i32
  }
}

</mosaic_0001>

<bundles_post_ra>
// kernel: tpu_custom_call.1
= control target key start
LH: loop header
LB: loop body
LE: loop exit
PB: predicated region body
PF: predicated region fallthrough
CT: control target
= control target key end

     0   :  { %s2597_s0 = inlined_call_operand.vmem [shape: f32[2,16,32], index: 0, kind: input, shape index: {}]   ;;  %s2598_s1 = inlined_call_operand.vmem [shape: f32[2,16,32], index: 1, kind: input, shape index: {}]   ;;  %s2599_s2 = inlined_call_operand.vmem [shape: f32[1,32], index: 2, kind: input, shape index: {}]   ;;  %s2600_s3 = inlined_call_operand.vmem [shape: f32[1,32], index: 3, kind: input, shape index: {}]   ;;  %s2601_s4 = inlined_call_operand.vmem [shape: f32[4,32,8], index: 4, kind: input, shape index: {}]   ;;  %s2602_s5 = inlined_call_operand.vmem [shape: f32[4,32,8], index: 5, kind: input, shape index: {}]   ;;  %s2603_s6 = inlined_call_operand.vmem [shape: f32[4,32,8], index: 6, kind: input, shape index: {}]   ;;  %s2604_s7 = inlined_call_operand.vmem [shape: f32[4,8,32], index: 7, kind: input, shape index: {}]   ;;  %s2605_s8 = inlined_call_operand.vmem [shape: f32[1,32], index: 8, kind: input, shape index: {}]   ;;  %s2606_s9 = inlined_call_operand.vmem [shape: f32[1,32], index: 9, kind: input, shape index: {}]   ;;  %s2607_s10 = inlined_call_operand.vmem [shape: f32[1,32], index: 10, kind: input, shape index: {}]   ;;  %s2608_s11 = inlined_call_operand.vmem [shape: f32[32,128], index: 11, kind: input, shape index: {}]   ;;  %s2609_s12 = inlined_call_operand.vmem [shape: f32[1,128], index: 12, kind: input, shape index: {}]   ;;  %s2610_s13 = inlined_call_operand.vmem [shape: f32[128,32], index: 13, kind: input, shape index: {}]   ;;  %s2611_s14 = inlined_call_operand.vmem [shape: f32[1,32], index: 14, kind: input, shape index: {}]   ;;  %s2612_s15 = inlined_call_operand.hbm [shape: f32[2,16,32], index: 15, kind: output, shape index: {}]  }
   0x1   :  { %2632 = sst [smem:[#allocation26_spill]] %s2597_s0 }
   0x2   :  { %2633 = sst [smem:[#allocation27_spill]] %s2606_s9 }
   0x3   :  { %2634 = sst [smem:[#allocation28_spill]] %s2607_s10 }
   0x4   :  { %2635 = sst [smem:[#allocation29_spill]] %s2608_s11 }
   0x5   :  { %2636 = sst [smem:[#allocation30_spill]] %s2609_s12 }
   0x6   :  { %2637 = sst [smem:[#allocation31_spill]] %s2610_s13 }
   0x7   :  { %2638 = sst [smem:[#allocation32_spill]] %s2611_s14 }
   0x8   :  { %2639 = sst [smem:[#allocation33_spill]] %s2612_s15 }
   0x9   :  { %20 = vsyncpa [#allocation8], 0 }
   0xa   :  { %22 = vsyncpa [#allocation8 + $0x1], 0  ;;  %s2242_s18 = smov 0   ;;  %s2244_s19 = smov 0  }
   0xb   :  { %s2246_s20 = smov 0   ;;  %s2248_s21 = smov 0  }
   0xc   :  { %s2250_s22 = smov 0   ;;  %s2252_s23 = smov 0  }
   0xd   :  { %s2254_s24 = smov 0   ;;  %s2256_s25 = smov 0  }
   0xe   :  { %s2258_s26 = smov 0   ;;  %s2260_s27 = smov 0  }
   0xf   :  { %s2262_s28 = smov 0   ;;  %s2264_s29 = smov 0  }
  0x10 LB: > { %2640 = sst [smem:[#allocation10_spill]] %s2100_s18  ;;  %s1648_s30 = sadd.s32 4294967295, %s2144_s29   ;;  %s2144_s29 = sphi %s2264_s29, %s28_s29   ;;  %s2140_s28 = sphi %s2262_s28, %s2685_s28   ;;  %s2136_s27 = sphi %s2260_s27, %s2684_s27   ;;  %s2132_s26 = sphi %s2258_s26, %s2683_s26   ;;  %s2128_s25 = sphi %s2256_s25, %s2682_s25   ;;  %s2124_s24 = sphi %s2254_s24, %s2681_s24   ;;  %s2120_s23 = sphi %s2252_s23, %s2680_s23   ;;  %s2116_s22 = sphi %s2250_s22, %s2679_s22   ;;  %s2112_s21 = sphi %s2248_s21, %s2678_s21   ;;  %s2108_s20 = sphi %s2246_s20, %s2677_s20   ;;  %s2104_s19 = sphi %s2244_s19, %s2676_s19   ;;  %s2100_s18 = sphi %s2242_s18, %s2675_s18  }
  0x11   : > { %2641 = sst [smem:[#allocation11_spill]] %s2104_s19  ;;  %s1649_s16 = sadd.s32 4294967294, %s2144_s29  }
  0x12   : > { %2642 = sst [smem:[#allocation12_spill]] %s2108_s20  ;;  %s43_s17 = sadd.s32 1, %s2128_s25 }
  0x13   : > { %2643 = sst [smem:[#allocation13_spill]] %s2124_s24  ;;  %p44_p0 = scmp.ge.s32.totalorder %s43_s17, 2 }
  0x14   : > { %2644 = sst [smem:[#allocation14_spill]] %s2128_s25  ;;  %s46_s15 = sadd.s32 1, %s2132_s26 }
  0x15   : > { %2645 = sst [smem:[#allocation15_spill]] %s2132_s26  ;;  %s50_s14 = sadd.s32 1, %s2136_s27 }
  0x16   : > { %2646 = sst [smem:[#allocation16_spill]] %s2136_s27  ;;  %s54_s12 = sadd.s32 1, %s2140_s28 }
  0x17   : > { %2647 = sst [smem:[#allocation17_spill]] %s2140_s28  ;;  %s2687_s17 = smov (%p44_p0, %s43_s17), 0 }
  0x18   : > { %2648 = sst [smem:[#allocation18_spill]] %s2144_s29  ;;  %s2689_s15 = smov (!%p44_p0, %s46_s15), %s2132_s26 }
  0x19   : > { %2649 = sst [smem:[#allocation19_spill]] %s2687_s17  ;;  %p422_p1 = scmp.ne.s32.totalorder %s2108_s20, %s2104_s19 }
  0x1a   : > { %p423_p2 = scmp.eq.s32.totalorder %s1648_s30, 31  ;;  %p48_p3 = scmp.ge.s32.totalorder %s2689_s15, 4 }
  0x1b   : > { %p428_p4 = scmp.ne.s32.totalorder %s2104_s19, %s2100_s18  ;;  %p429_p6 = scmp.eq.s32.totalorder %s1649_s16, 31 }
  0x1c   : > { %p2315_p5 = por %p423_p2, %p422_p1  ;;  %s2691_s15 = smov (%p48_p3, %s2689_s15), 0 }
  0x1d   : > { %2652 = sst [smem:[#allocation21_spill]] %s2691_s15  ;;  %s2693_s14 = smov (!%p48_p3, %s50_s14), %s2136_s27 }
  0x1e   : > { %s2650_s10 = scalar_select %p2315_p5, 1, 0 }
  0x1f   : > { %p2322_p7 = por %p429_p6, %p428_p4  ;;  %p1652_p8 = scmp.ge.s32.totalorder %s2144_s29, 1 }
  0x20   : > { %2651 = sst [smem:[#allocation20_spill]] %s2650_s10  ;;  %p52_p9 = scmp.ge.s32.totalorder %s2693_s14, 2 }
  0x21   : > { %s2653_s25 = scalar_select %p2322_p7, 1, 0 }
  0x22   : > { %p527_p10 = scmp.lt.s32.totalorder %s2144_s29, 33  ;;  %s2695_s14 = smov (%p52_p9, %s2693_s14), 0 }
  0x23   : > { %2654 = sst [smem:[#allocation22_spill]] %s2653_s25  ;;  %s2697_s12 = smov (!%p52_p9, %s54_s12), %s2140_s28 }
  0x24   : > { %2655 = sst [smem:[#allocation23_spill]] %s2695_s14  ;;  %p528_p11 = pnand %p1652_p8, %p527_p10 }
  0x25   : > { %p56_p12 = scmp.ge.s32.totalorder %s2697_s12, 2  ;;  %s408_s30 = ssub.s32 %s2136_s27, %s2695_s14 }
  0x26   : > { %s412_s17 = sadd.s32 1, %s2108_s20  ;;  %s2623_s14 = sand.u32 (!%p528_p11), 1, %s2104_s19  }
  0x27   : > { %s2699_s12 = smov (%p56_p12, %s2697_s12), 0  ;;  %p605_p0 = scmp.lt.s32.totalorder (!%p528_p11), %s2124_s24, 1 }
  0x28   : > { %2656 = sst [smem:[#allocation24_spill]] %s2699_s12  ;;  %s407_s16 = ssub.s32 %s2140_s28, %s2699_s12 }
  0x29   : > { %s409_s15 = sor.u32 %s408_s30, %s407_s16  ;;  %531 = sbr.rel (%p528_p11) target bundleno = 3002 (0xbba), region = 80 }
  0x2a   : > { %p410_p13 = scmp.eq.s32.totalorder %s409_s15, 0  ;;  %s2345_s30 = sshll.u32 (!%p528_p11), %s2623_s14, 3 }
  0x2b   : > { %p607_p1 = scmp.lt.s32.totalorder (!%p528_p11), %s2120_s23, 1  ;;  %p615_p2 = scmp.lt.s32.totalorder (!%p528_p11), %s2112_s21, 1 }
  0x2c   : > { %s2339_s26 = scalar_select %p410_p13, %s2108_s20, %s412_s17  }
  0x2d   : > { %p621_p3 = scmp.lt.s32.totalorder (!%p528_p11), %s2116_s22, 3  ;;  %p640_p4 = scmp.eq.s32.totalorder (!%p528_p11), %s2116_s22, 0 }
  0x2e   : > { %2657 = sst [smem:[#allocation25_spill]] %s2339_s26  ;;  %p641_p6 = scmp.eq.s32.totalorder (!%p528_p11), %s2112_s21, 0 }
  0x2f   : > { %s2658_s0 = sld [smem:[#allocation26_spill]] (!%p528_p11) }
  0x30   : > { %s606_s15 = scalar_select %p605_p0, %s2124_s24, 1 }
  0x31   : > { %s608_s17 = scalar_select %p607_p1, %s2120_s23, 1 }
  0x32   : > { %s1654_s16 = sshll.u32 %s606_s15, 1  ;;  %p642_p8 = pnand %p641_p6, %p640_p4 }
  0x33   : > { %s610_s12 = sadd.s32 %s1654_s16, %s608_s17  ;;  %s604_s24 = scalar_lea.vmem [#allocation7], %s2345_s30  ;;  %vm646_vm0 = vcmask (!%p642_p8), 261120   ;;  %v2146_v0 = vmov (!%p642_p8), 0.0  }
  0x34   : > { %s1655_s28 = sshll.u32 %s610_s12, 3  ;;  %647 = vst.msk [vmem:[#allocation6] sm:$0xff] (!%p642_p8), %vm646_vm0, %v2146_v0 }
  0x35   : > { %s2357_s20 = scalar_lea.vmem %s2658_s0, %s1655_s28 }
  0x36   : > { %s616_s25 = scalar_select %p615_p2, %s2112_s21, 1 }
  0x37   : > { %s622_s18 = scalar_select %p621_p3, %s2116_s22, 3 }
  0x38   : > { %s618_s14 = sadd.s32 %s1654_s16, %s616_s25  ;;  %645 = sbr.rel (%p642_p8) target bundleno = 63 (0x3f), region = 84 }
  0x39   : > { %s1657_s29 = sshll.u32 %s618_s14, 3  ;;  %s1693_s10 = sshll.u32 %s622_s18, 5 }
  0x3a   : > { %s2364_s15 = scalar_lea.vmem %s2598_s1, %s1657_s29  ;;  %s625_s12 = scalar_lea.vmem %s2601_s4, %s1693_s10 }
  0x3b   : > { %s2372_s26 = scalar_lea.vmem %s2602_s5, %s1693_s10  ;;  %s2377_s25 = scalar_lea.vmem %s2603_s6, %s1693_s10 }
  0x3c   : > { %s1664_s14 = sshll.u32 %s622_s18, 3 }
  0x3d   : > { %s2382_s19 = scalar_lea.vmem %s2604_s7, %s1664_s14 }
  0x3f PF: > { %p1665_p9 = scmp.ne.s32.totalorder %s2112_s21, 0 }
  0x40   : > { %v651_v1 = vld [vmem:[%s2357_s20] sm:$0xff] (!%p1665_p9)  ;;  %vm654_vm1 = vcmask (!%p1665_p9), 261120   ;;  %v684_v9 = vld [vmem:[%s625_s12 + $0x8] sm:$0xff] (!%p1665_p9)  ;;  %v685_v10 = vld [vmem:[%s625_s12 + $0x10] sm:$0xff] (!%p1665_p9)  ;;  %v2147_v11 = vmov (!%p1665_p9), 0.0|0.0   ;;  %vm2148_vm2 = vmmov (!%p1665_p9), 0  }
  0x41   : > { %650 = sbr.rel (%p1665_p9) target bundleno = 593 (0x251), region = 88  ;;  %v655_v2 = vsel (!%p1665_p9), %vm654_vm1, %v651_v1, 0.0  ;;  %v683_v8 = vld [vmem:[%s625_s12] sm:$0xff] (!%p1665_p9)  ;;  %1835 = vmatprep.subr.bf16.mxu0 (!%p1665_p9), %v2147_v11  ;;  %v686_v13 = vld [vmem:[%s625_s12 + $0x18] sm:$0xff] (!%p1665_p9)  ;;  %v2149_v14 = vmov (!%p1665_p9), 0.0   ;;  %vm763_vm3 = vcmask (!%p1665_p9), 7168  }
  0x42   : > { %656 = vadd.xlane.f32.xlu0 (!%p1665_p9), %v655_v2  ;;  %v1836_v12 = vpack.c.bf16 (!%p1665_p9), %v684_v9, %v683_v8  ;;  %1749 = vmatprep.mubr.msk.f32.mxu0 (!%p1665_p9), %vm2148_vm2, %v2149_v14  ;;  %v2150_v15 = vmov (!%p1665_p9), -1e+30   ;;  %765 = vst.msk [vmem:[#allocation4] sm:$0xff] (!%p1665_p9), %vm763_vm3, %v2149_v14  ;;  %v1839_v16 = vpack.c.bf16 (!%p1665_p9), %v686_v13, %v685_v10  ;;  %v1666_v21 = vld [vmem:[%s2599_s2] ss:$0 sm:$0xff] (!%p1665_p9)  ;;  %vm761_vm4 = vcmask (!%p1665_p9), 64512  }
  0x43   : > { %764 = vst.msk [vmem:[#allocation3] sm:$0xff] (!%p1665_p9), %vm763_vm3, %v2150_v15  ;;  %v1667_v23 = vld [vmem:[%s2600_s3] ss:$0 sm:$0xff] (!%p1665_p9) }
  0x44   : > { %1837 = vmatpush3.bf16.msra.mxu0 (!%p1665_p9), %v1836_v12  ;;  %766 = vst.msk [vmem:[#allocation5] sm:$0xff] (!%p1665_p9), %vm761_vm4, %v2149_v14 }
  0x45   : > { %1838 = vmatprep.subr.bf16.mxu0 (!%p1665_p9), %v2147_v11 }
  0x48   : > { %1840 = vmatpush3.bf16.msra.mxu0 %v1839_v16 }
  0xcf   : > { %v657_v3 = vpop.xlane.xlu0 %656 }
  0xd0   : > { %v659_v4 = vmul.f32 0.03125, %v657_v3 }
  0xd2   : > { %v660_v5 = vsub.f32 %v651_v1, %v659_v4 }
  0xd4   : > { %v661_v6 = vmul.f32 %v660_v5, %v660_v5 }
  0xd6   : > { %v662_v7 = vsel %vm654_vm1, %v661_v6, 0.0 }
  0xd7   : > { %663 = vadd.xlane.f32.xlu0 %v662_v7 }
 0x164   : > { %v664_v17 = vpop.xlane.xlu0 %663 }
 0x165   : > { %v665_v18 = vmul.f32 0.03125, %v664_v17 }
 0x167   : > { %v666_v19 = vadd.f32 1e-05, %v665_v18 }
 0x169   : > { %2001 = vrsqrt.f32 %v666_v19 }
 0x173   : > { %v2002_v20 = vpop.eup %2001 }
 0x174   : > { %v668_v22 = vmul.f32 %v2002_v20, %v660_v5 }
 0x176   : > { %v675_v24 = vmul.f32 %v1666_v21, %v668_v22 }
 0x178   : > { %v682_v25 = vadd.f32 %v1667_v23, %v675_v24 }
 0x17a   : > { %1750 = vmatmul.mubr.msk.f32.vlgmr.msra.gmra.mrb[0].mxu0 %vm654_vm1, %v682_v25 }
 0x24d   : > { %v756_v26 = vpop.f32.mrb[0].mxu0 }
 0x24e   : > { %v760_v27 = vmul.f32 0.35355338, %v756_v26  ;;  %v1751_v28 = vpop.f32.mrb[1].mxu0 }
 0x250   : > { %762 = vst.msk [vmem:[#allocation2] sm:$0xff] %vm761_vm4, %v760_v27 }
 0x251 PF: > { %s1669_s13 = sshll.u32 %s2112_s21, 3  ;;  %s1696_s18 = sshll.u32 %s2120_s23, 3 }
 0x252   : > { %s1697_s29 = sadd.s32 8, %s1696_s18 }
 0x253   : > { %p1671_p10 = scmp.ge.s32.totalorder %s1669_s13, %s1697_s29 }
 0x254   : > { %v774_v29 = vld [vmem:[%s2364_s15] sm:$0xff] (!%p1671_p10)  ;;  %vm777_vm5 = vcmask (!%p1671_p10), 261120   ;;  %v807_v37 = vld [vmem:[%s2372_s26 + $0x8] sm:$0xff] (!%p1671_p10)  ;;  %v2151_v39 = vmov (!%p1671_p10), 0.0|0.0   ;;  %v808_v42 = vld [vmem:[%s2372_s26 + $0x10] sm:$0xff] (!%p1671_p10)  ;;  %vm2152_vm6 = vmmov (!%p1671_p10), 0   ;;  %v1036_v0 = vlaneseq (!%p1671_p10) }
 0x255   : > { %773 = sbr.rel (%p1671_p10) target bundleno = 1841 (0x731), region = 92  ;;  %v778_v30 = vsel (!%p1671_p10), %vm777_vm5, %v774_v29, 0.0  ;;  %v806_v36 = vld [vmem:[%s2372_s26] sm:$0xff] (!%p1671_p10)  ;;  %1841 = vmatprep.subr.bf16.mxu0 (!%p1671_p10), %v2151_v39  ;;  %1847 = vmatprep.subr.bf16.mxu1 (!%p1671_p10), %v2151_v39  ;;  %v884_v41 = vld [vmem:[%s2377_s25 + $0x8] sm:$0xff] (!%p1671_p10)  ;;  %v809_v43 = vld [vmem:[%s2372_s26 + $0x18] sm:$0xff] (!%p1671_p10)  ;;  %v2153_v47 = vmov (!%p1671_p10), 0.0   ;;  %v1038_v3 = vstv (!%p1671_p10), %s1696_s18 }
 0x256   : > { %779 = vadd.xlane.f32.xlu0 (!%p1671_p10), %v778_v30  ;;  %v883_v38 = vld [vmem:[%s2377_s25] sm:$0xff] (!%p1671_p10)  ;;  %v1842_v40 = vpack.c.bf16 (!%p1671_p10), %v807_v37, %v806_v36  ;;  %v885_v45 = vld [vmem:[%s2377_s25 + $0x10] sm:$0xff] (!%p1671_p10)  ;;  %v886_v46 = vld [vmem:[%s2377_s25 + $0x18] sm:$0xff] (!%p1671_p10)  ;;  %1760 = vmatprep.mubr.msk.f32.mxu0 (!%p1671_p10), %vm2152_vm6, %v2153_v47  ;;  %v1845_v48 = vpack.c.bf16 (!%p1671_p10), %v809_v43, %v808_v42  ;;  %vm958_vm7 = vcmask (!%p1671_p10), 64512   ;;  %v1037_v1 = vshrl.u32 (!%p1671_p10), %v1036_v0, 7 }
 0x257   : > { %v1848_v44 = vpack.c.bf16 (!%p1671_p10), %v884_v41, %v883_v38  ;;  %1771 = vmatprep.mubr.msk.f32.mxu1 (!%p1671_p10), %vm2152_vm6, %v2153_v47  ;;  %v1851_v49 = vpack.c.bf16 (!%p1671_p10), %v886_v46, %v885_v45  ;;  %v1672_v54 = vld [vmem:[%s2599_s2] ss:$0 sm:$0xff] (!%p1671_p10)  ;;  %v1041_v2 = vand.u32 (!%p1671_p10), 127, %v1036_v0  ;;  %v1042_v4 = vstv (!%p1671_p10), %s1669_s13  ;;  %v1046_v12 = vld [vmem:[#allocation3] sm:$0xff] (!%p1671_p10)  ;;  %v1062_v23 = vld [vmem:[#allocation4] sm:$0xff] (!%p1671_p10) }
 0x258   : > { %1843 = vmatpush3.bf16.msra.mxu0 (!%p1671_p10), %v1842_v40  ;;  %v1673_v56 = vld [vmem:[%s2600_s3] ss:$0 sm:$0xff] (!%p1671_p10)  ;;  %v1039_v5 = vadd.s32 (!%p1671_p10), %v1038_v3, %v1037_v1  ;;  %v2154_v11 = vmov (!%p1671_p10), 0   ;;  %vm1068_vm9 = vcmask (!%p1671_p10), 7168   ;;  %v1070_v27 = vld [vmem:[#allocation5] sm:$0xff] (!%p1671_p10) }
 0x259   : > { %1849 = vmatpush3.bf16.msra.mxu1 (!%p1671_p10), %v1848_v44  ;;  %1844 = vmatprep.subr.bf16.mxu0 (!%p1671_p10), %v2151_v39  ;;  %v957_v63 = vld [vmem:[#allocation2] sm:$0xff] (!%p1671_p10)  ;;  %v1043_v6 = vadd.s32 (!%p1671_p10), %v1042_v4, %v1041_v2 }
 0x25a   : > { %1850 = vmatprep.subr.bf16.mxu1 (!%p1671_p10), %v2151_v39  ;;  %2003 = vset.pattern.permute.xlu1 (!%p1671_p10), %v2154_v11 }
 0x25b   : > { %vm1044_vm8 = vcmp.ge.s32.totalorder (!%p1671_p10), %v1039_v5, %v1043_v6  ;;  %2004 = vset.pattern.permute.xlu0 (!%p1671_p10), %v2154_v11 }
 0x25c   : > { %1846 = vmatpush3.bf16.msra.mxu0 %v1845_v48 }
 0x25d   : > { %1852 = vmatpush3.bf16.msra.mxu1 %v1851_v49  ;;  %1774 = vmatprep.subr.mxu0 %v2153_v47 }
 0x25e   : > { %1779 = vmatprep.subr.mxu1 %v2153_v47 }
 0x2e3   : > { %v780_v31 = vpop.xlane.xlu0 %779 }
 0x2e4   : > { %v782_v32 = vmul.f32 0.03125, %v780_v31 }
 0x2e6   : > { %v783_v33 = vsub.f32 %v774_v29, %v782_v32 }
 0x2e8   : > { %v784_v34 = vmul.f32 %v783_v33, %v783_v33 }
 0x2ea   : > { %v785_v35 = vsel %vm777_vm5, %v784_v34, 0.0 }
 0x2eb   : > { %786 = vadd.xlane.f32.xlu0 %v785_v35 }
 0x378   : > { %v787_v50 = vpop.xlane.xlu0 %786 }
 0x379   : > { %v788_v51 = vmul.f32 0.03125, %v787_v50 }
 0x37b   : > { %v789_v52 = vadd.f32 1e-05, %v788_v51 }
 0x37d   : > { %2005 = vrsqrt.f32 %v789_v52 }
 0x387   : > { %v2006_v53 = vpop.eup %2005 }
 0x388   : > { %v791_v55 = vmul.f32 %v2006_v53, %v783_v33 }
 0x38a   : > { %v798_v57 = vmul.f32 %v1672_v54, %v791_v55 }
 0x38c   : > { %v805_v58 = vadd.f32 %v1673_v56, %v798_v57 }
 0x38e   : > { %1761 = vmatmul.mubr.msk.f32.vlgmr.msra.gmra.mrb[0].mxu0 %vm777_vm5, %v805_v58  ;;  %1772 = vmatmul.mubr.msk.f32.vlgmr.msra.gmra.mrb[0].mxu1 %vm777_vm5, %v805_v58 }
 0x38f   : > { %1776 = vmatprep.mubr.msk.f32.mxu0 %vm2152_vm6, %v2153_v47  ;;  %1781 = vmatprep.mubr.msk.f32.mxu1 %vm2152_vm6, %v2153_v47 }
 0x461   : > { %v879_v59 = vpop.f32.mrb[0].mxu0  ;;  %v953_v60 = vpop.f32.mrb[0].mxu1 }
 0x462   : > { %v1762_v61 = vpop.f32.mrb[1].mxu0  ;;  %v1773_v62 = vpop.f32.mrb[1].mxu1  ;;  %1775 = vmatpush3.xpose.msk.msra.mxu0 %vm958_vm7, %v879_v59  ;;  %1780 = vmatpush3.msra.mxu1 %v953_v60 }
 0x465   : > { %1777 = vmatmul.mubr.msk.f32.vlgmr.msra.gmra.mrb[2].mxu0 %vm958_vm7, %v957_v63 }
 0x538   : > { %v1031_v7 = vpop.f32.mrb[2].mxu0 }
 0x539   : > { %v1045_v8 = vsel %vm1044_vm8, %v1031_v7, -1e+30  ;;  %v1778_v9 = vpop.f32.mrb[3].mxu0 }
 0x53a   : > { %v1047_v10 = vsel %vm958_vm7, %v1045_v8, -inf }
 0x53b   : > { %1048 = vmax.xlane.f32.xlu1 %v1047_v10 }
 0x5c8   : > { %v1049_v13 = vpop.xlane.xlu1 %1048 }
 0x5c9   : > { %v1050_v14 = vmax.f32 %v1046_v12, %v1049_v13 }
 0x5cb   : > { %v1051_v15 = vsub.f32 %v1046_v12, %v1050_v14  ;;  %1152 = vst.msk [vmem:[#allocation3] sm:$0xff] %vm1068_vm9, %v1050_v14  ;;  %1056 = vperm.xlu1 %2003, %v1050_v14  }
 0x5cd   : > { %v1052_v21 = vmul.f32 1.442695, %v1051_v15 }
 0x64a   : > { %v1057_v16 = vpop.permute.xlu1 %1056 }
 0x64b   : > { %v1059_v17 = vsub.f32 %v1045_v8, %v1057_v16 }
 0x64d   : > { %v1060_v18 = vmul.f32 1.442695, %v1059_v17 }
 0x64f   : > { %2007 = vpow2.f32 %v1060_v18 }
 0x650   : > { %2009 = vpow2.f32 %v1052_v21 }
 0x659   : > { %v2008_v19 = vpop.eup %2007 }
 0x65a   : > { %1782 = vmatmul.mubr.msk.f32.vlgmr.msra.gmra.mrb[2].mxu1 %vm958_vm7, %v2008_v19  ;;  %v1064_v20 = vsel %vm958_vm7, %v2008_v19, 0.0  ;;  %v2010_v22 = vpop.eup %2009 }
 0x65b   : > { %1065 = vadd.xlane.f32.xlu0 %v1064_v20  ;;  %v1063_v24 = vmul.f32 %v2010_v22, %v1062_v23 }
 0x671   : > { %1073 = vperm.xlu0 %2004, %v2010_v22  }
 0x6e8   : > { %v1066_v25 = vpop.xlane.xlu0 %1065 }
 0x6e9   : > { %v1067_v26 = vadd.f32 %v1066_v25, %v1063_v24 }
 0x6eb   : > { %1069 = vst.msk [vmem:[#allocation4] sm:$0xff] %vm1068_vm9, %v1067_v26 }
 0x6f0   : > { %v1074_v28 = vpop.permute.xlu0 %1073 }
 0x6f1   : > { %v1076_v29 = vmul.f32 %v1074_v28, %v1070_v27 }
 0x72d   : > { %v1146_v30 = vpop.f32.mrb[2].mxu1 }
 0x72e   : > { %v1150_v31 = vadd.f32 %v1146_v30, %v1076_v29  ;;  %v1783_v32 = vpop.f32.mrb[3].mxu1 }
 0x730   : > { %1151 = vst.msk [vmem:[#allocation5] sm:$0xff] %vm958_vm7, %v1150_v31 }
 0x731 PF: > { %p1153_p11 = scmp.eq.s32.totalorder %s2112_s21, 1  ;;  %p1680_p12 = scmp.ne.s32.totalorder %s2112_s21, 1 }
 0x732   : > { %v1158_v33 = vld [vmem:[#allocation4] sm:$0xff] (!%p1680_p12)  ;;  %v2155_v34 = vmov (!%p1680_p12), 0   ;;  %v2156_v36 = vmov (!%p1680_p12), 0.0   ;;  %v1167_v37 = vld [vmem:[%s2382_s19] sm:$0xff] (!%p1680_p12)  ;;  %vm2157_vm10 = vmmov (!%p1680_p12), 0   ;;  %vm1168_vm11 = vcmask (!%p1680_p12), 64512  }
 0x733   : > { %1156 = sbr.rel (%p1680_p12) target bundleno = 2199 (0x897), region = 96  ;;  %2011 = vset.pattern.permute.xlu0 (!%p1680_p12), %v2155_v34  ;;  %2012 = vrcp.f32 (!%p1680_p12), %v1158_v33  ;;  %1784 = vmatprep.subr.mxu0 (!%p1680_p12), %v2156_v36  ;;  %v1166_v41 = vld [vmem:[#allocation6] sm:$0xff] (!%p1680_p12)  ;;  %vm1243_vm12 = vcmask (!%p1680_p12), 261120  }
 0x734   : > { %1785 = vmatpush3.msra.mxu0 (!%p1680_p12), %v1167_v37  ;;  %1786 = vmatprep.mubr.msk.f32.mxu0 (!%p1680_p12), %vm2157_vm10, %v2156_v36 }
 0x737   : > { %v1157_v38 = vld [vmem:[#allocation5] sm:$0xff] (!%p1680_p12) }
 0x73d   : > { %v2013_v35 = vpop.eup %2012 }
 0x73e   : > { %1162 = vperm.xlu0 %2011, %v2013_v35  }
 0x7bd   : > { %v1163_v39 = vpop.permute.xlu0 %1162 }
 0x7be   : > { %v1165_v40 = vmul.f32 %v1163_v39, %v1157_v38 }
 0x7c0   : > { %1787 = vmatmul.mubr.msk.f32.vlgmr.msra.gmra.mrb[0].mxu0 %vm1168_vm11, %v1165_v40 }
 0x893   : > { %v1238_v42 = vpop.f32.mrb[0].mxu0 }
 0x894   : > { %v1242_v43 = vadd.f32 %v1238_v42, %v1166_v41  ;;  %v1788_v44 = vpop.f32.mrb[1].mxu0 }
 0x896   : > { %1244 = vst.msk [vmem:[#allocation6] sm:$0xff] %vm1243_vm12, %v1242_v43 }
 0x897 PF: > { %p1245_p13 = scmp.eq.s32.totalorder %s2116_s22, 3 }
 0x899   : > { %p1246_p0 = pnand %p1245_p13, %p1153_p11 }
 0x89a   : > { %v1250_v45 = vld [vmem:[%s2357_s20] sm:$0xff] (!%p1246_p0)  ;;  %vm1263_vm13 = vcmask (!%p1246_p0), 261120   ;;  %s2659_s22 = sld [smem:[#allocation29_spill]] (!%p1246_p0)  ;;  %v2158_v59 = vmov (!%p1246_p0), 0.0|0.0   ;;  %vm2159_vm14 = vmmov (!%p1246_p0), 0   ;;  %v2160_v62 = vmov (!%p1246_p0), 0.0  }
 0x89b   : > { %1249 = sbr.rel (%p1246_p0) target bundleno = 2971 (0xb9b), region = 100  ;;  %v1682_v47 = vld [vmem:[%s2605_s8] ss:$0 sm:$0xff] (!%p1246_p0)  ;;  %1853 = vmatprep.subr.bf16.mxu0 (!%p1246_p0), %v2158_v59  ;;  %1797 = vmatprep.mubr.msk.f32.mxu0 (!%p1246_p0), %vm2159_vm14, %v2160_v62  ;;  %s2661_s18 = sld [smem:[#allocation31_spill]] (!%p1246_p0) }
 0x89c   : > { %1859 = vmatprep.subr.bf16.mxu1 (!%p1246_p0), %v2158_v59  ;;  %1832 = vmatprep.mubr.msk.f32.mxu1 (!%p1246_p0), %vm2159_vm14, %v2160_v62  ;;  %s2663_s0 = sld [smem:[#allocation27_spill]] (!%p1246_p0)  ;;  %s2664_s11 = sld [smem:[#allocation28_spill]] (!%p1246_p0) }
 0x89d   : > { %v1251_v46 = vld [vmem:[#allocation6] sm:$0xff] (!%p1246_p0)  ;;  %s2665_s12 = sld [smem:[#allocation30_spill]] (!%p1246_p0)  ;;  %s2666_s28 = sld [smem:[#allocation32_spill]] (!%p1246_p0) }
 0x89e   : > { %v1252_v48 = vadd.f32 (!%p1246_p0), %v1251_v46, %v1250_v45 }
 0x8a0   : > { %v2447_v49 = vadd.f32 (!%p1246_p0), %v1682_v47, %v1252_v48  ;;  %s2660_s14 = smov (!%p1246_p0), %s2659_s22  ;;  %v1292_v56 = vld [vmem:[%s2659_s22] sm:$0xff] (!%p1246_p0) }
 0x8a1   : > { %v1293_v57 = vld [vmem:[%s2660_s14 + $0x8] sm:$0xff] (!%p1246_p0)  ;;  %v1294_v58 = vld [vmem:[%s2660_s14 + $0x10] sm:$0xff] (!%p1246_p0)  ;;  %v1295_v61 = vld [vmem:[%s2660_s14 + $0x18] sm:$0xff] (!%p1246_p0)  ;;  %s2662_s15 = smov (!%p1246_p0), %s2661_s18 }
 0x8a2   : > { %v1264_v50 = vsel %vm1263_vm13, %v2447_v49, 0.0  ;;  %v1854_v60 = vpack.c.bf16 %v1293_v57, %v1292_v56  ;;  %v1857_v63 = vpack.c.bf16 %v1295_v61, %v1294_v58  ;;  %v1381_v0 = vld [vmem:[%s2661_s18] sm:$0xff]  ;;  %v1382_v1 = vld [vmem:[%s2662_s15 + $0x8] sm:$0xff]  ;;  %v1383_v2 = vld [vmem:[%s2662_s15 + $0x10] sm:$0xff] }
 0x8a3   : > { %1265 = vadd.xlane.f32.xlu0 %v1264_v50  ;;  %v1860_v3 = vpack.c.bf16 %v1382_v1, %v1381_v0  ;;  %v1384_v4 = vld [vmem:[%s2662_s15 + $0x18] sm:$0xff]  ;;  %v1385_v6 = vld [vmem:[%s2662_s15 + $0x20] sm:$0xff]  ;;  %v1386_v7 = vld [vmem:[%s2662_s15 + $0x28] sm:$0xff] }
 0x8a4   : > { %1855 = vmatpush3.bf16.msra.mxu0 %v1854_v60  ;;  %v1863_v5 = vpack.c.bf16 %v1384_v4, %v1383_v2  ;;  %v1866_v8 = vpack.c.bf16 %v1386_v7, %v1385_v6  ;;  %v1683_v13 = vld [vmem:[%s2663_s0] ss:$0 sm:$0xff]  ;;  %v1387_v18 = vld [vmem:[%s2662_s15 + $0x30] sm:$0xff]  ;;  %v1388_v19 = vld [vmem:[%s2662_s15 + $0x38] sm:$0xff] }
 0x8a5   : > { %1856 = vmatprep.subr.bf16.mxu0 %v2158_v59  ;;  %1861 = vmatpush3.bf16.msra.mxu1 %v1860_v3  ;;  %v1684_v15 = vld [vmem:[%s2664_s11] ss:$0 sm:$0xff]  ;;  %v1869_v20 = vpack.c.bf16 %v1388_v19, %v1387_v18  ;;  %v1390_v22 = vld [vmem:[%s2662_s15 + $0x48] sm:$0xff]  ;;  %v1391_v24 = vld [vmem:[%s2662_s15 + $0x50] sm:$0xff] }
 0x8a6   : > { %1862 = vmatprep.subr.bf16.mxu1 %v2158_v59  ;;  %v1389_v21 = vld [vmem:[%s2662_s15 + $0x40] sm:$0xff]  ;;  %v1392_v25 = vld [vmem:[%s2662_s15 + $0x58] sm:$0xff]  ;;  %v1394_v28 = vld [vmem:[%s2662_s15 + $0x68] sm:$0xff] }
 0x8a7   : > { %v1872_v23 = vpack.c.bf16 %v1390_v22, %v1389_v21  ;;  %v1875_v26 = vpack.c.bf16 %v1392_v25, %v1391_v24  ;;  %v1393_v27 = vld [vmem:[%s2662_s15 + $0x60] sm:$0xff]  ;;  %v1395_v30 = vld [vmem:[%s2662_s15 + $0x70] sm:$0xff]  ;;  %v1396_v31 = vld [vmem:[%s2662_s15 + $0x78] sm:$0xff] }
 0x8a8   : > { %1858 = vmatpush3.bf16.msra.mxu0 %v1857_v63  ;;  %v1878_v29 = vpack.c.bf16 %v1394_v28, %v1393_v27  ;;  %v1881_v32 = vpack.c.bf16 %v1396_v31, %v1395_v30  ;;  %v1685_v33 = vld [vmem:[%s2665_s12] ss:$0 sm:$0xff] }
 0x8a9   : > { %1864 = vmatpush3.bf16.msra.mxu1 %v1863_v5  ;;  %v1687_v42 = vld [vmem:[%s2666_s28] ss:$0 sm:$0xff] }
 0x8aa   : > { %1865 = vmatprep.subr.bf16.mxu1 %v2158_v59 }
 0x8ad   : > { %1867 = vmatpush3.bf16.msra.mxu1 %v1866_v8 }
 0x8ae   : > { %1868 = vmatprep.subr.bf16.mxu1 %v2158_v59 }
 0x8b1   : > { %1870 = vmatpush3.bf16.msra.mxu1 %v1869_v20 }
 0x8b2   : > { %1871 = vmatprep.subr.bf16.mxu1 %v2158_v59 }
 0x8b5   : > { %1873 = vmatpush3.bf16.msra.mxu1 %v1872_v23 }
 0x8b6   : > { %1874 = vmatprep.subr.bf16.mxu1 %v2158_v59 }
 0x8b9   : > { %1876 = vmatpush3.bf16.msra.mxu1 %v1875_v26 }
 0x8ba   : > { %1877 = vmatprep.subr.bf16.mxu1 %v2158_v59 }
 0x8bd   : > { %1879 = vmatpush3.bf16.msra.mxu1 %v1878_v29 }
 0x8be   : > { %1880 = vmatprep.subr.bf16.mxu1 %v2158_v59 }
 0x8c1   : > { %1882 = vmatpush3.bf16.msra.mxu1 %v1881_v32 }
 0x930   : > { %v1266_v51 = vpop.xlane.xlu0 %1265 }
 0x931   : > { %v1268_v52 = vmul.f32 0.03125, %v1266_v51 }
 0x933   : > { %v1269_v53 = vsub.f32 %v2447_v49, %v1268_v52 }
 0x935   : > { %v1270_v54 = vmul.f32 %v1269_v53, %v1269_v53 }
 0x937   : > { %v1271_v55 = vsel %vm1263_vm13, %v1270_v54, 0.0 }
 0x938   : > { %1272 = vadd.xlane.f32.xlu0 %v1271_v55 }
 0x9c5   : > { %v1273_v9 = vpop.xlane.xlu0 %1272 }
 0x9c6   : > { %v1274_v10 = vmul.f32 0.03125, %v1273_v9 }
 0x9c8   : > { %v1275_v11 = vadd.f32 1e-05, %v1274_v10 }
 0x9ca   : > { %2014 = vrsqrt.f32 %v1275_v11 }
 0x9d4   : > { %v2015_v12 = vpop.eup %2014 }
 0x9d5   : > { %v1277_v14 = vmul.f32 %v2015_v12, %v1269_v53 }
 0x9d7   : > { %v1284_v16 = vmul.f32 %v1683_v13, %v1277_v14 }
 0x9d9   : > { %v1291_v17 = vadd.f32 %v1684_v15, %v1284_v16 }
 0x9db   : > { %1798 = vmatmul.mubr.msk.f32.vlgmr.msra.gmra.mrb[0].mxu0 %vm1263_vm13, %v1291_v17 }
 0xaae   : > { %v1372_v34 = vpop.f32.mrb[0].mxu0 }
 0xaaf   : > { %v1373_v35 = vadd.f32 %v1685_v33, %v1372_v34  ;;  %v1799_v36 = vpop.f32.mrb[1].mxu0 }
 0xab1   : > { %v1377_v37 = vmul.f32 0.70710677, %v1373_v35  ;;  %v1376_v39 = vmul.f32 0.5, %v1373_v35 }
 0xab3   : > { %2016 = verf.f32 %v1377_v37 }
 0xabd   : > { %v2017_v38 = vpop.eup %2016 }
 0xabe   : > { %v1379_v40 = vadd.f32 1.0, %v2017_v38 }
 0xac0   : > { %v1380_v41 = vmul.f32 %v1379_v40, %v1376_v39 }
 0xac2   : > { %1833 = vmatmul.mubr.f32.vlgmr.msra.gmra.mrb[0].mxu1 %v1380_v41 }
 0xb95   : > { %v1470_v43 = vpop.f32.mrb[0].mxu1 }
 0xb96   : > { %v1471_v44 = vadd.f32 %v1687_v42, %v1470_v43  ;;  %v1834_v45 = vpop.f32.mrb[1].mxu1 }
 0xb98   : > { %v1474_v46 = vadd.f32 %v1471_v44, %v2447_v49 }
 0xb9a   : > { %1475 = vst.msk [vmem:[%s604_s24] sm:$0xff] %vm1263_vm13, %v1474_v46 }
 0xb9b PF: > { %s2667_s20 = sld [smem:[#allocation13_spill]]  ;;  %s2668_s21 = sld [smem:[#allocation11_spill]] }
 0xb9c   : > { %s1492_s19 = sshll.u32 %s604_s24, 4  ;;  %s2670_s11 = sld [smem:[#allocation33_spill]]  ;;  %s2534_s19 = int_to_ptr.vmem [resolvable:$true] %s1492_s19 }
 0xb9d   : > { %s2018_s17 = scalar_lea.vmem %s2534_s19, 128 }
 0xb9e   : > { %p2019_p1 = scmp.ne.s32.totalorder %s2534_s19, %s2018_s17 }
 0xba0   : > { %p2020_p2 = pnand %p2019_p1, %p2315_p5 }
 0xba1   : > { %s1689_s25 = sshll.u32 %s2667_s20, 1  ;;  %s2671_s18 = sand.u32 1, %s2668_s21  }
 0xba2   : > { %s1488_s16 = sadd.s32 %s2120_s23, %s1689_s25  ;;  %s1477_s29 = scalar_lea.sflag [#allocation8], %s2671_s18 }
 0xba3   : > { %s1690_s0 = sshll.u32 %s1488_s16, 7  ;;  %p2021_p3 = pneg %p2020_p2 }
 0xba4   : > { %s1490_s13 = scalar_lea.hbm %s2670_s11, %s1690_s0  ;;  %s2161_s23 = smov [#allocation7]  }
 0xba5   : > { %s2022_s30 = sshll.u32 %s2161_s23, 4  ;;  %s2023_s30 = int_to_ptr.vmem [resolvable:$false] %s2022_s30 }
 0xba6   : > { %s2024_s24 = scalar_lea.vmem %s2023_s30, 256  ;;  %p2025_p4 = scmp.lt.s32.totalorder %s2534_s19, %s2023_s30 }
 0xba7   : > { %p2026_p6 = scmp.lt.s32.totalorder %s2024_s24, %s2018_s17 }
 0xba9   : > { %p2027_p8 = por %p2026_p6, %p2025_p4 }
 0xbab   : > { %p2028_p9 = pnand %p2027_p8, %p2021_p3 }
 0xbad   : > { %2031 = shalt.err (!%p2028_p9)
}
 0xbae   : > { %s2032_s12 = scalar_lea.hbm %s1490_s13, 128  ;;  %s2036_s28 = scalar_lea.hbm %s2670_s11, 512 }
 0xbaf   : > { %p2033_p10 = scmp.ne.s32.totalorder %s1490_s13, %s2032_s12  ;;  %p2037_p13 = scmp.lt.u32.totalorder %s1490_s13, %s2670_s11 }
 0xbb0   : > { %p2038_p0 = scmp.lt.u32.totalorder %s2036_s28, %s2032_s12  ;;  %p2040_p2 = scmp.lt.u32.totalorder %s2032_s12, %s1490_s13 }
 0xbb1   : > { %p2034_p11 = pnand %p2033_p10, %p2315_p5 }
 0xbb2   : > { %p2039_p1 = por %p2038_p0, %p2037_p13 }
 0xbb3   : > { %p2035_p12 = pneg %p2034_p11 }
 0xbb4   : > { %p2041_p4 = por %p2040_p2, %p2039_p1 }
 0xbb6   : > { %p2042_p3 = pnand %p2041_p4, %p2035_p12 }
 0xbb8   : > { %2045 = shalt.err (!%p2042_p3)
}
 0xbb9   : > { %1883 = dma.vmem_to_hbm [thread:$0]  (%p2315_p5), %s2534_s19, 128, %s1490_s13, %s1477_s29  }
 0xbba PF: > { %s2672_s25 = sld [smem:[#allocation18_spill]]  ;;  %s2673_s16 = sld [smem:[#allocation10_spill]] }
 0xbc0   : > { %p1889_p6 = scmp.ge.s32.totalorder %s2672_s25, 2  ;;  %s1504_s9 = sand.u32 1, %s2673_s16  }
 0xbc1   : > { %s1505_s10 = scalar_lea.sflag [#allocation8], %s1504_s9 }
 0xbc2   : > { %p1886_p8 = pnand %p1889_p6, %p2322_p7 }
 0xbc4   : > { %2095 = dma.done.wait (!%p1886_p8), %s1505_s10, 128  }
 0xbc5   : > { %2097 = vsyncadd (!%p1886_p8), %s1505_s10, 4294967168  ;;  %s28_s29 = sadd.s32 1, %s2672_s25   ;;  %s2675_s18 = sld [smem:[#allocation11_spill]] }
 0xbc6   : > { %p25_p9 = scmp.ge.s32.totalorder %s28_s29, 34   ;;  %s2676_s19 = sld [smem:[#allocation12_spill]] }
 0xbc7   : > { %s2677_s20 = sld [smem:[#allocation25_spill]]  ;;  %s2679_s22 = sld [smem:[#allocation15_spill]] }
 0xbc8   : > { %s2678_s21 = sld [smem:[#allocation14_spill]]  ;;  %s2680_s23 = sld [smem:[#allocation16_spill]] }
 0xbc9   : > { %s2681_s24 = sld [smem:[#allocation17_spill]]  ;;  %s2682_s25 = sld [smem:[#allocation19_spill]] }
 0xbca   : > { %s2683_s26 = sld [smem:[#allocation21_spill]]  ;;  %s2684_s27 = sld [smem:[#allocation23_spill]] }
 0xbcb   : > { %s2685_s28 = sld [smem:[#allocation24_spill]]  ;;  %27 = sbr.rel (!%p25_p9) target bundleno = 16 (0x10), region = 150 }
 0xbd2   :  { %1510 = vsyncpa [#allocation8], 1 }
 0xbd3   :  { %1512 = vsyncpa [#allocation8 + $0x1], 1 }

// kernel: tpu_custom_call.1
= control target key start
LH: loop header
LB: loop body
LE: loop exit
PB: predicated region body
PF: predicated region fallthrough
CT: control target
= control target key end

     0   :  { %s2597_s0 = inlined_call_operand.vmem [shape: f32[2,16,32], index: 0, kind: input, shape index: {}]   ;;  %s2598_s1 = inlined_call_operand.vmem [shape: f32[2,16,32], index: 1, kind: input, shape index: {}]   ;;  %s2599_s2 = inlined_call_operand.vmem [shape: f32[1,32], index: 2, kind: input, shape index: {}]   ;;  %s2600_s3 = inlined_call_operand.vmem [shape: f32[1,32], index: 3, kind: input, shape index: {}]   ;;  %s2601_s4 = inlined_call_operand.vmem [shape: f32[4,32,8], index: 4, kind: input, shape index: {}]   ;;  %s2602_s5 = inlined_call_operand.vmem [shape: f32[4,32,8], index: 5, kind: input, shape index: {}]   ;;  %s2603_s6 = inlined_call_operand.vmem [shape: f32[4,32,8], index: 6, kind: input, shape index: {}]   ;;  %s2604_s7 = inlined_call_operand.vmem [shape: f32[4,8,32], index: 7, kind: input, shape index: {}]   ;;  %s2605_s8 = inlined_call_operand.vmem [shape: f32[1,32], index: 8, kind: input, shape index: {}]   ;;  %s2606_s9 = inlined_call_operand.vmem [shape: f32[1,32], index: 9, kind: input, shape index: {}]   ;;  %s2607_s10 = inlined_call_operand.vmem [shape: f32[1,32], index: 10, kind: input, shape index: {}]   ;;  %s2608_s11 = inlined_call_operand.vmem [shape: f32[32,128], index: 11, kind: input, shape index: {}]   ;;  %s2609_s12 = inlined_call_operand.vmem [shape: f32[1,128], index: 12, kind: input, shape index: {}]   ;;  %s2610_s13 = inlined_call_operand.vmem [shape: f32[128,32], index: 13, kind: input, shape index: {}]   ;;  %s2611_s14 = inlined_call_operand.vmem [shape: f32[1,32], index: 14, kind: input, shape index: {}]   ;;  %s2612_s15 = inlined_call_operand.hbm [shape: f32[2,16,32], index: 15, kind: output, shape index: {}]  }
   0x1   :  { %2632 = sst [smem:[#allocation26_spill]] %s2597_s0 }
   0x2   :  { %2633 = sst [smem:[#allocation27_spill]] %s2606_s9 }
   0x3   :  { %2634 = sst [smem:[#allocation28_spill]] %s2607_s10 }
   0x4   :  { %2635 = sst [smem:[#allocation29_spill]] %s2608_s11 }
   0x5   :  { %2636 = sst [smem:[#allocation30_spill]] %s2609_s12 }
   0x6   :  { %2637 = sst [smem:[#allocation31_spill]] %s2610_s13 }
   0x7   :  { %2638 = sst [smem:[#allocation32_spill]] %s2611_s14 }
   0x8   :  { %2639 = sst [smem:[#allocation33_spill]] %s2612_s15 }
   0x9   :  { %20 = vsyncpa [#allocation8], 0 }
   0xa   :  { %22 = vsyncpa [#allocation8 + $0x1], 0  ;;  %s2242_s18 = smov 0   ;;  %s2244_s19 = smov 0  }
   0xb   :  { %s2246_s20 = smov 0   ;;  %s2248_s21 = smov 0  }
   0xc   :  { %s2250_s22 = smov 0   ;;  %s2252_s23 = smov 0  }
   0xd   :  { %s2254_s24 = smov 0   ;;  %s2256_s25 = smov 0  }
   0xe   :  { %s2258_s26 = smov 0   ;;  %s2260_s27 = smov 0  }
   0xf   :  { %s2262_s28 = smov 0   ;;  %s2264_s29 = smov 0  }
  0x10 LB: > { %2640 = sst [smem:[#allocation10_spill]] %s2100_s18  ;;  %s1648_s30 = sadd.s32 4294967295, %s2144_s29   ;;  %s2144_s29 = sphi %s2264_s29, %s28_s29   ;;  %s2140_s28 = sphi %s2262_s28, %s2685_s28   ;;  %s2136_s27 = sphi %s2260_s27, %s2684_s27   ;;  %s2132_s26 = sphi %s2258_s26, %s2683_s26   ;;  %s2128_s25 = sphi %s2256_s25, %s2682_s25   ;;  %s2124_s24 = sphi %s2254_s24, %s2681_s24   ;;  %s2120_s23 = sphi %s2252_s23, %s2680_s23   ;;  %s2116_s22 = sphi %s2250_s22, %s2679_s22   ;;  %s2112_s21 = sphi %s2248_s21, %s2678_s21   ;;  %s2108_s20 = sphi %s2246_s20, %s2677_s20   ;;  %s2104_s19 = sphi %s2244_s19, %s2676_s19   ;;  %s2100_s18 = sphi %s2242_s18, %s2675_s18  }
  0x11   : > { %2641 = sst [smem:[#allocation11_spill]] %s2104_s19  ;;  %s1649_s16 = sadd.s32 4294967294, %s2144_s29  }
  0x12   : > { %2642 = sst [smem:[#allocation12_spill]] %s2108_s20  ;;  %s43_s17 = sadd.s32 1, %s2128_s25 }
  0x13   : > { %2643 = sst [smem:[#allocation13_spill]] %s2124_s24  ;;  %p44_p0 = scmp.ge.s32.totalorder %s43_s17, 2 }
  0x14   : > { %2644 = sst [smem:[#allocation14_spill]] %s2128_s25  ;;  %s46_s15 = sadd.s32 1, %s2132_s26 }
  0x15   : > { %2645 = sst [smem:[#allocation15_spill]] %s2132_s26  ;;  %s50_s14 = sadd.s32 1, %s2136_s27 }
  0x16   : > { %2646 = sst [smem:[#allocation16_spill]] %s2136_s27  ;;  %s54_s12 = sadd.s32 1, %s2140_s28 }
  0x17   : > { %2647 = sst [smem:[#allocation17_spill]] %s2140_s28  ;;  %s2687_s17 = smov (%p44_p0, %s43_s17), 0 }
  0x18   : > { %2648 = sst [smem:[#allocation18_spill]] %s2144_s29  ;;  %s2689_s15 = smov (!%p44_p0, %s46_s15), %s2132_s26 }
  0x19   : > { %2649 = sst [smem:[#allocation19_spill]] %s2687_s17  ;;  %p422_p1 = scmp.ne.s32.totalorder %s2108_s20, %s2104_s19 }
  0x1a   : > { %p423_p2 = scmp.eq.s32.totalorder %s1648_s30, 31  ;;  %p48_p3 = scmp.ge.s32.totalorder %s2689_s15, 4 }
  0x1b   : > { %p428_p4 = scmp.ne.s32.totalorder %s2104_s19, %s2100_s18  ;;  %p429_p6 = scmp.eq.s32.totalorder %s1649_s16, 31 }
  0x1c   : > { %p2315_p5 = por %p423_p2, %p422_p1  ;;  %s2691_s15 = smov (%p48_p3, %s2689_s15), 0 }
  0x1d   : > { %2652 = sst [smem:[#allocation21_spill]] %s2691_s15  ;;  %s2693_s14 = smov (!%p48_p3, %s50_s14), %s2136_s27 }
  0x1e   : > { %s2650_s10 = scalar_select %p2315_p5, 1, 0 }
  0x1f   : > { %p2322_p7 = por %p429_p6, %p428_p4  ;;  %p1652_p8 = scmp.ge.s32.totalorder %s2144_s29, 1 }
  0x20   : > { %2651 = sst [smem:[#allocation20_spill]] %s2650_s10  ;;  %p52_p9 = scmp.ge.s32.totalorder %s2693_s14, 2 }
  0x21   : > { %s2653_s25 = scalar_select %p2322_p7, 1, 0 }
  0x22   : > { %p527_p10 = scmp.lt.s32.totalorder %s2144_s29, 33  ;;  %s2695_s14 = smov (%p52_p9, %s2693_s14), 0 }
  0x23   : > { %2654 = sst [smem:[#allocation22_spill]] %s2653_s25  ;;  %s2697_s12 = smov (!%p52_p9, %s54_s12), %s2140_s28 }
  0x24   : > { %2655 = sst [smem:[#allocation23_spill]] %s2695_s14  ;;  %p528_p11 = pnand %p1652_p8, %p527_p10 }
  0x25   : > { %p56_p12 = scmp.ge.s32.totalorder %s2697_s12, 2  ;;  %s408_s30 = ssub.s32 %s2136_s27, %s2695_s14 }
  0x26   : > { %s412_s17 = sadd.s32 1, %s2108_s20  ;;  %s2623_s14 = sand.u32 (!%p528_p11), 1, %s2104_s19  }
  0x27   : > { %s2699_s12 = smov (%p56_p12, %s2697_s12), 0  ;;  %p605_p0 = scmp.lt.s32.totalorder (!%p528_p11), %s2124_s24, 1 }
  0x28   : > { %2656 = sst [smem:[#allocation24_spill]] %s2699_s12  ;;  %s407_s16 = ssub.s32 %s2140_s28, %s2699_s12 }
  0x29   : > { %s409_s15 = sor.u32 %s408_s30, %s407_s16  ;;  %531 = sbr.rel (%p528_p11) target bundleno = 3002 (0xbba), region = 80 }
  0x2a   : > { %p410_p13 = scmp.eq.s32.totalorder %s409_s15, 0  ;;  %s2345_s30 = sshll.u32 (!%p528_p11), %s2623_s14, 3 }
  0x2b   : > { %p607_p1 = scmp.lt.s32.totalorder (!%p528_p11), %s2120_s23, 1  ;;  %p615_p2 = scmp.lt.s32.totalorder (!%p528_p11), %s2112_s21, 1 }
  0x2c   : > { %s2339_s26 = scalar_select %p410_p13, %s2108_s20, %s412_s17  }
  0x2d   : > { %p621_p3 = scmp.lt.s32.totalorder (!%p528_p11), %s2116_s22, 3  ;;  %p640_p4 = scmp.eq.s32.totalorder (!%p528_p11), %s2116_s22, 0 }
  0x2e   : > { %2657 = sst [smem:[#allocation25_spill]] %s2339_s26  ;;  %p641_p6 = scmp.eq.s32.totalorder (!%p528_p11), %s2112_s21, 0 }
  0x2f   : > { %s2658_s0 = sld [smem:[#allocation26_spill]] (!%p528_p11) }
  0x30   : > { %s606_s15 = scalar_select %p605_p0, %s2124_s24, 1 }
  0x31   : > { %s608_s17 = scalar_select %p607_p1, %s2120_s23, 1 }
  0x32   : > { %s1654_s16 = sshll.u32 %s606_s15, 1  ;;  %p642_p8 = pnand %p641_p6, %p640_p4 }
  0x33   : > { %s610_s12 = sadd.s32 %s1654_s16, %s608_s17  ;;  %s604_s24 = scalar_lea.vmem [#allocation7], %s2345_s30  ;;  %vm646_vm0 = vcmask (!%p642_p8), 261120   ;;  %v2146_v0 = vmov (!%p642_p8), 0.0  }
  0x34   : > { %s1655_s28 = sshll.u32 %s610_s12, 3  ;;  %647 = vst.msk [vmem:[#allocation6] sm:$0xff] (!%p642_p8), %vm646_vm0, %v2146_v0 }
  0x35   : > { %s2357_s20 = scalar_lea.vmem %s2658_s0, %s1655_s28 }
  0x36   : > { %s616_s25 = scalar_select %p615_p2, %s2112_s21, 1 }
  0x37   : > { %s622_s18 = scalar_select %p621_p3, %s2116_s22, 3 }
  0x38   : > { %s618_s14 = sadd.s32 %s1654_s16, %s616_s25  ;;  %645 = sbr.rel (%p642_p8) target bundleno = 63 (0x3f), region = 84 }
  0x39   : > { %s1657_s29 = sshll.u32 %s618_s14, 3  ;;  %s1693_s10 = sshll.u32 %s622_s18, 5 }
  0x3a   : > { %s2364_s15 = scalar_lea.vmem %s2598_s1, %s1657_s29  ;;  %s625_s12 = scalar_lea.vmem %s2601_s4, %s1693_s10 }
  0x3b   : > { %s2372_s26 = scalar_lea.vmem %s2602_s5, %s1693_s10  ;;  %s2377_s25 = scalar_lea.vmem %s2603_s6, %s1693_s10 }
  0x3c   : > { %s1664_s14 = sshll.u32 %s622_s18, 3 }
  0x3d   : > { %s2382_s19 = scalar_lea.vmem %s2604_s7, %s1664_s14 }
  0x3f PF: > { %p1665_p9 = scmp.ne.s32.totalorder %s2112_s21, 0 }
  0x40   : > { %v651_v1 = vld [vmem:[%s2357_s20] sm:$0xff] (!%p1665_p9)  ;;  %vm654_vm1 = vcmask (!%p1665_p9), 261120   ;;  %v684_v9 = vld [vmem:[%s625_s12 + $0x8] sm:$0xff] (!%p1665_p9)  ;;  %v685_v10 = vld [vmem:[%s625_s12 + $0x10] sm:$0xff] (!%p1665_p9)  ;;  %v2147_v11 = vmov (!%p1665_p9), 0.0|0.0   ;;  %vm2148_vm2 = vmmov (!%p1665_p9), 0  }
  0x41   : > { %650 = sbr.rel (%p1665_p9) target bundleno = 593 (0x251), region = 88  ;;  %v655_v2 = vsel (!%p1665_p9), %vm654_vm1, %v651_v1, 0.0  ;;  %v683_v8 = vld [vmem:[%s625_s12] sm:$0xff] (!%p1665_p9)  ;;  %1835 = vmatprep.subr.bf16.mxu0 (!%p1665_p9), %v2147_v11  ;;  %v686_v13 = vld [vmem:[%s625_s12 + $0x18] sm:$0xff] (!%p1665_p9)  ;;  %v2149_v14 = vmov (!%p1665_p9), 0.0   ;;  %vm763_vm3 = vcmask (!%p1665_p9), 7168  }
  0x42   : > { %656 = vadd.xlane.f32.xlu0 (!%p1665_p9), %v655_v2  ;;  %v1836_v12 = vpack.c.bf16 (!%p1665_p9), %v684_v9, %v683_v8  ;;  %1749 = vmatprep.mubr.msk.f32.mxu0 (!%p1665_p9), %vm2148_vm2, %v2149_v14  ;;  %v2150_v15 = vmov (!%p1665_p9), -1e+30   ;;  %765 = vst.msk [vmem:[#allocation4] sm:$0xff] (!%p1665_p9), %vm763_vm3, %v2149_v14  ;;  %v1839_v16 = vpack.c.bf16 (!%p1665_p9), %v686_v13, %v685_v10  ;;  %v1666_v21 = vld [vmem:[%s2599_s2] ss:$0 sm:$0xff] (!%p1665_p9)  ;;  %vm761_vm4 = vcmask (!%p1665_p9), 64512  }
  0x43   : > { %764 = vst.msk [vmem:[#allocation3] sm:$0xff] (!%p1665_p9), %vm763_vm3, %v2150_v15  ;;  %v1667_v23 = vld [vmem:[%s2600_s3] ss:$0 sm:$0xff] (!%p1665_p9) }
  0x44   : > { %1837 = vmatpush3.bf16.msra.mxu0 (!%p1665_p9), %v1836_v12  ;;  %766 = vst.msk [vmem:[#allocation5] sm:$0xff] (!%p1665_p9), %vm761_vm4, %v2149_v14 }
  0x45   : > { %1838 = vmatprep.subr.bf16.mxu0 (!%p1665_p9), %v2147_v11 }
  0x48   : > { %1840 = vmatpush3.bf16.msra.mxu0 %v1839_v16 }
  0xcf   : > { %v657_v3 = vpop.xlane.xlu0 %656 }
  0xd0   : > { %v659_v4 = vmul.f32 0.03125, %v657_v3 }
  0xd2   : > { %v660_v5 = vsub.f32 %v651_v1, %v659_v4 }
  0xd4   : > { %v661_v6 = vmul.f32 %v660_v5, %v660_v5 }
  0xd6   : > { %v662_v7 = vsel %vm654_vm1, %v661_v6, 0.0 }
  0xd7   : > { %663 = vadd.xlane.f32.xlu0 %v662_v7 }
 0x164   : > { %v664_v17 = vpop.xlane.xlu0 %663 }
 0x165   : > { %v665_v18 = vmul.f32 0.03125, %v664_v17 }
 0x167   : > { %v666_v19 = vadd.f32 1e-05, %v665_v18 }
 0x169   : > { %2001 = vrsqrt.f32 %v666_v19 }
 0x173   : > { %v2002_v20 = vpop.eup %2001 }
 0x174   : > { %v668_v22 = vmul.f32 %v2002_v20, %v660_v5 }
 0x176   : > { %v675_v24 = vmul.f32 %v1666_v21, %v668_v22 }
 0x178   : > { %v682_v25 = vadd.f32 %v1667_v23, %v675_v24 }
 0x17a   : > { %1750 = vmatmul.mubr.msk.f32.vlgmr.msra.gmra.mrb[0].mxu0 %vm654_vm1, %v682_v25 }
 0x24d   : > { %v756_v26 = vpop.f32.mrb[0].mxu0 }
 0x24e   : > { %v760_v27 = vmul.f32 0.35355338, %v756_v26  ;;  %v1751_v28 = vpop.f32.mrb[1].mxu0 }
 0x250   : > { %762 = vst.msk [vmem:[#allocation2] sm:$0xff] %vm761_vm4, %v760_v27 }
 0x251 PF: > { %s1669_s13 = sshll.u32 %s2112_s21, 3  ;;  %s1696_s18 = sshll.u32 %s2120_s23, 3 }
 0x252   : > { %s1697_s29 = sadd.s32 8, %s1696_s18 }
 0x253   : > { %p1671_p10 = scmp.ge.s32.totalorder %s1669_s13, %s1697_s29 }
 0x254   : > { %v774_v29 = vld [vmem:[%s2364_s15] sm:$0xff] (!%p1671_p10)  ;;  %vm777_vm5 = vcmask (!%p1671_p10), 261120   ;;  %v807_v37 = vld [vmem:[%s2372_s26 + $0x8] sm:$0xff] (!%p1671_p10)  ;;  %v2151_v39 = vmov (!%p1671_p10), 0.0|0.0   ;;  %v808_v42 = vld [vmem:[%s2372_s26 + $0x10] sm:$0xff] (!%p1671_p10)  ;;  %vm2152_vm6 = vmmov (!%p1671_p10), 0   ;;  %v1036_v0 = vlaneseq (!%p1671_p10) }
 0x255   : > { %773 = sbr.rel (%p1671_p10) target bundleno = 1841 (0x731), region = 92  ;;  %v778_v30 = vsel (!%p1671_p10), %vm777_vm5, %v774_v29, 0.0  ;;  %v806_v36 = vld [vmem:[%s2372_s26] sm:$0xff] (!%p1671_p10)  ;;  %1841 = vmatprep.subr.bf16.mxu0 (!%p1671_p10), %v2151_v39  ;;  %1847 = vmatprep.subr.bf16.mxu1 (!%p1671_p10), %v2151_v39  ;;  %v884_v41 = vld [vmem:[%s2377_s25 + $0x8] sm:$0xff] (!%p1671_p10)  ;;  %v809_v43 = vld [vmem:[%s2372_s26 + $0x18] sm:$0xff] (!%p1671_p10)  ;;  %v2153_v47 = vmov (!%p1671_p10), 0.0   ;;  %v1038_v3 = vstv (!%p1671_p10), %s1696_s18 }
 0x256   : > { %779 = vadd.xlane.f32.xlu0 (!%p1671_p10), %v778_v30  ;;  %v883_v38 = vld [vmem:[%s2377_s25] sm:$0xff] (!%p1671_p10)  ;;  %v1842_v40 = vpack.c.bf16 (!%p1671_p10), %v807_v37, %v806_v36  ;;  %v885_v45 = vld [vmem:[%s2377_s25 + $0x10] sm:$0xff] (!%p1671_p10)  ;;  %v886_v46 = vld [vmem:[%s2377_s25 + $0x18] sm:$0xff] (!%p1671_p10)  ;;  %1760 = vmatprep.mubr.msk.f32.mxu0 (!%p1671_p10), %vm2152_vm6, %v2153_v47  ;;  %v1845_v48 = vpack.c.bf16 (!%p1671_p10), %v809_v43, %v808_v42  ;;  %vm958_vm7 = vcmask (!%p1671_p10), 64512   ;;  %v1037_v1 = vshrl.u32 (!%p1671_p10), %v1036_v0, 7 }
 0x257   : > { %v1848_v44 = vpack.c.bf16 (!%p1671_p10), %v884_v41, %v883_v38  ;;  %1771 = vmatprep.mubr.msk.f32.mxu1 (!%p1671_p10), %vm2152_vm6, %v2153_v47  ;;  %v1851_v49 = vpack.c.bf16 (!%p1671_p10), %v886_v46, %v885_v45  ;;  %v1672_v54 = vld [vmem:[%s2599_s2] ss:$0 sm:$0xff] (!%p1671_p10)  ;;  %v1041_v2 = vand.u32 (!%p1671_p10), 127, %v1036_v0  ;;  %v1042_v4 = vstv (!%p1671_p10), %s1669_s13  ;;  %v1046_v12 = vld [vmem:[#allocation3] sm:$0xff] (!%p1671_p10)  ;;  %v1062_v23 = vld [vmem:[#allocation4] sm:$0xff] (!%p1671_p10) }
 0x258   : > { %1843 = vmatpush3.bf16.msra.mxu0 (!%p1671_p10), %v1842_v40  ;;  %v1673_v56 = vld [vmem:[%s2600_s3] ss:$0 sm:$0xff] (!%p1671_p10)  ;;  %v1039_v5 = vadd.s32 (!%p1671_p10), %v1038_v3, %v1037_v1  ;;  %v2154_v11 = vmov (!%p1671_p10), 0   ;;  %vm1068_vm9 = vcmask (!%p1671_p10), 7168   ;;  %v1070_v27 = vld [vmem:[#allocation5] sm:$0xff] (!%p1671_p10) }
 0x259   : > { %1849 = vmatpush3.bf16.msra.mxu1 (!%p1671_p10), %v1848_v44  ;;  %1844 = vmatprep.subr.bf16.mxu0 (!%p1671_p10), %v2151_v39  ;;  %v957_v63 = vld [vmem:[#allocation2] sm:$0xff] (!%p1671_p10)  ;;  %v1043_v6 = vadd.s32 (!%p1671_p10), %v1042_v4, %v1041_v2 }
 0x25a   : > { %1850 = vmatprep.subr.bf16.mxu1 (!%p1671_p10), %v2151_v39  ;;  %2003 = vset.pattern.permute.xlu1 (!%p1671_p10), %v2154_v11 }
 0x25b   : > { %vm1044_vm8 = vcmp.ge.s32.totalorder (!%p1671_p10), %v1039_v5, %v1043_v6  ;;  %2004 = vset.pattern.permute.xlu0 (!%p1671_p10), %v2154_v11 }
 0x25c   : > { %1846 = vmatpush3.bf16.msra.mxu0 %v1845_v48 }
 0x25d   : > { %1852 = vmatpush3.bf16.msra.mxu1 %v1851_v49  ;;  %1774 = vmatprep.subr.mxu0 %v2153_v47 }
 0x25e   : > { %1779 = vmatprep.subr.mxu1 %v2153_v47 }
 0x2e3   : > { %v780_v31 = vpop.xlane.xlu0 %779 }
 0x2e4   : > { %v782_v32 = vmul.f32 0.03125, %v780_v31 }
 0x2e6   : > { %v783_v33 = vsub.f32 %v774_v29, %v782_v32 }
 0x2e8   : > { %v784_v34 = vmul.f32 %v783_v33, %v783_v33 }
 0x2ea   : > { %v785_v35 = vsel %vm777_vm5, %v784_v34, 0.0 }
 0x2eb   : > { %786 = vadd.xlane.f32.xlu0 %v785_v35 }
 0x378   : > { %v787_v50 = vpop.xlane.xlu0 %786 }
 0x379   : > { %v788_v51 = vmul.f32 0.03125, %v787_v50 }
 0x37b   : > { %v789_v52 = vadd.f32 1e-05, %v788_v51 }
 0x37d   : > { %2005 = vrsqrt.f32 %v789_v52 }
 0x387   : > { %v2006_v53 = vpop.eup %2005 }
 0x388   : > { %v791_v55 = vmul.f32 %v2006_v53, %v783_v33 }
 0x38a   : > { %v798_v57 = vmul.f32 %v1672_v54, %v791_v55 }
 0x38c   : > { %v805_v58 = vadd.f32 %v1673_v56, %v798_v57 }
 0x38e   : > { %1761 = vmatmul.mubr.msk.f32.vlgmr.msra.gmra.mrb[0].mxu0 %vm777_vm5, %v805_v58  ;;  %1772 = vmatmul.mubr.msk.f32.vlgmr.msra.gmra.mrb[0].mxu1 %vm777_vm5, %v805_v58 }
 0x38f   : > { %1776 = vmatprep.mubr.msk.f32.mxu0 %vm2152_vm6, %v2153_v47  ;;  %1781 = vmatprep.mubr.msk.f32.mxu1 %vm2152_vm6, %v2153_v47 }
 0x461   : > { %v879_v59 = vpop.f32.mrb[0].mxu0  ;;  %v953_v60 = vpop.f32.mrb[0].mxu1 }
 0x462   : > { %v1762_v61 = vpop.f32.mrb[1].mxu0  ;;  %v1773_v62 = vpop.f32.mrb[1].mxu1  ;;  %1775 = vmatpush3.xpose.msk.msra.mxu0 %vm958_vm7, %v879_v59  ;;  %1780 = vmatpush3.msra.mxu1 %v953_v60 }
 0x465   : > { %1777 = vmatmul.mubr.msk.f32.vlgmr.msra.gmra.mrb[2].mxu0 %vm958_vm7, %v957_v63 }
 0x538   : > { %v1031_v7 = vpop.f32.mrb[2].mxu0 }
 0x539   : > { %v1045_v8 = vsel %vm1044_vm8, %v1031_v7, -1e+30  ;;  %v1778_v9 = vpop.f32.mrb[3].mxu0 }
 0x53a   : > { %v1047_v10 = vsel %vm958_vm7, %v1045_v8, -inf }
 0x53b   : > { %1048 = vmax.xlane.f32.xlu1 %v1047_v10 }
 0x5c8   : > { %v1049_v13 = vpop.xlane.xlu1 %1048 }
 0x5c9   : > { %v1050_v14 = vmax.f32 %v1046_v12, %v1049_v13 }
 0x5cb   : > { %v1051_v15 = vsub.f32 %v1046_v12, %v1050_v14  ;;  %1152 = vst.msk [vmem:[#allocation3] sm:$0xff] %vm1068_vm9, %v1050_v14  ;;  %1056 = vperm.xlu1 %2003, %v1050_v14  }
 0x5cd   : > { %v1052_v21 = vmul.f32 1.442695, %v1051_v15 }
 0x64a   : > { %v1057_v16 = vpop.permute.xlu1 %1056 }
 0x64b   : > { %v1059_v17 = vsub.f32 %v1045_v8, %v1057_v16 }
 0x64d   : > { %v1060_v18 = vmul.f32 1.442695, %v1059_v17 }
 0x64f   : > { %2007 = vpow2.f32 %v1060_v18 }
 0x650   : > { %2009 = vpow2.f32 %v1052_v21 }
 0x659   : > { %v2008_v19 = vpop.eup %2007 }
 0x65a   : > { %1782 = vmatmul.mubr.msk.f32.vlgmr.msra.gmra.mrb[2].mxu1 %vm958_vm7, %v2008_v19  ;;  %v1064_v20 = vsel %vm958_vm7, %v2008_v19, 0.0  ;;  %v2010_v22 = vpop.eup %2009 }
 0x65b   : > { %1065 = vadd.xlane.f32.xlu0 %v1064_v20  ;;  %v1063_v24 = vmul.f32 %v2010_v22, %v1062_v23 }
 0x671   : > { %1073 = vperm.xlu0 %2004, %v2010_v22  }
 0x6e8   : > { %v1066_v25 = vpop.xlane.xlu0 %1065 }
 0x6e9   : > { %v1067_v26 = vadd.f32 %v1066_v25, %v1063_v24 }
 0x6eb   : > { %1069 = vst.msk [vmem:[#allocation4] sm:$0xff] %vm1068_vm9, %v1067_v26 }
 0x6f0   : > { %v1074_v28 = vpop.permute.xlu0 %1073 }
 0x6f1   : > { %v1076_v29 = vmul.f32 %v1074_v28, %v1070_v27 }
 0x72d   : > { %v1146_v30 = vpop.f32.mrb[2].mxu1 }
 0x72e   : > { %v1150_v31 = vadd.f32 %v1146_v30, %v1076_v29  ;;  %v1783_v32 = vpop.f32.mrb[3].mxu1 }
 0x730   : > { %1151 = vst.msk [vmem:[#allocation5] sm:$0xff] %vm958_vm7, %v1150_v31 }
 0x731 PF: > { %p1153_p11 = scmp.eq.s32.totalorder %s2112_s21, 1  ;;  %p1680_p12 = scmp.ne.s32.totalorder %s2112_s21, 1 }
 0x732   : > { %v1158_v33 = vld [vmem:[#allocation4] sm:$0xff] (!%p1680_p12)  ;;  %v2155_v34 = vmov (!%p1680_p12), 0   ;;  %v2156_v36 = vmov (!%p1680_p12), 0.0   ;;  %v1167_v37 = vld [vmem:[%s2382_s19] sm:$0xff] (!%p1680_p12)  ;;  %vm2157_vm10 = vmmov (!%p1680_p12), 0   ;;  %vm1168_vm11 = vcmask (!%p1680_p12), 64512  }
 0x733   : > { %1156 = sbr.rel (%p1680_p12) target bundleno = 2199 (0x897), region = 96  ;;  %2011 = vset.pattern.permute.xlu0 (!%p1680_p12), %v2155_v34  ;;  %2012 = vrcp.f32 (!%p1680_p12), %v1158_v33  ;;  %1784 = vmatprep.subr.mxu0 (!%p1680_p12), %v2156_v36  ;;  %v1166_v41 = vld [vmem:[#allocation6] sm:$0xff] (!%p1680_p12)  ;;  %vm1243_vm12 = vcmask (!%p1680_p12), 261120  }
 0x734   : > { %1785 = vmatpush3.msra.mxu0 (!%p1680_p12), %v1167_v37  ;;  %1786 = vmatprep.mubr.msk.f32.mxu0 (!%p1680_p12), %vm2157_vm10, %v2156_v36 }
 0x737   : > { %v1157_v38 = vld [vmem:[#allocation5] sm:$0xff] (!%p1680_p12) }
 0x73d   : > { %v2013_v35 = vpop.eup %2012 }
 0x73e   : > { %1162 = vperm.xlu0 %2011, %v2013_v35  }
 0x7bd   : > { %v1163_v39 = vpop.permute.xlu0 %1162 }
 0x7be   : > { %v1165_v40 = vmul.f32 %v1163_v39, %v1157_v38 }
 0x7c0   : > { %1787 = vmatmul.mubr.msk.f32.vlgmr.msra.gmra.mrb[0].mxu0 %vm1168_vm11, %v1165_v40 }
 0x893   : > { %v1238_v42 = vpop.f32.mrb[0].mxu0 }
 0x894   : > { %v1242_v43 = vadd.f32 %v1238_v42, %v1166_v41  ;;  %v1788_v44 = vpop.f32.mrb[1].mxu0 }
 0x896   : > { %1244 = vst.msk [vmem:[#allocation6] sm:$0xff] %vm1243_vm12, %v1242_v43 }
 0x897 PF: > { %p1245_p13 = scmp.eq.s32.totalorder %s2116_s22, 3 }
 0x899   : > { %p1246_p0 = pnand %p1245_p13, %p1153_p11 }
 0x89a   : > { %v1250_v45 = vld [vmem:[%s2357_s20] sm:$0xff] (!%p1246_p0)  ;;  %vm1263_vm13 = vcmask (!%p1246_p0), 261120   ;;  %s2659_s22 = sld [smem:[#allocation29_spill]] (!%p1246_p0)  ;;  %v2158_v59 = vmov (!%p1246_p0), 0.0|0.0   ;;  %vm2159_vm14 = vmmov (!%p1246_p0), 0   ;;  %v2160_v62 = vmov (!%p1246_p0), 0.0  }
 0x89b   : > { %1249 = sbr.rel (%p1246_p0) target bundleno = 2971 (0xb9b), region = 100  ;;  %v1682_v47 = vld [vmem:[%s2605_s8] ss:$0 sm:$0xff] (!%p1246_p0)  ;;  %1853 = vmatprep.subr.bf16.mxu0 (!%p1246_p0), %v2158_v59  ;;  %1797 = vmatprep.mubr.msk.f32.mxu0 (!%p1246_p0), %vm2159_vm14, %v2160_v62  ;;  %s2661_s18 = sld [smem:[#allocation31_spill]] (!%p1246_p0) }
 0x89c   : > { %1859 = vmatprep.subr.bf16.mxu1 (!%p1246_p0), %v2158_v59  ;;  %1832 = vmatprep.mubr.msk.f32.mxu1 (!%p1246_p0), %vm2159_vm14, %v2160_v62  ;;  %s2663_s0 = sld [smem:[#allocation27_spill]] (!%p1246_p0)  ;;  %s2664_s11 = sld [smem:[#allocation28_spill]] (!%p1246_p0) }
 0x89d   : > { %v1251_v46 = vld [vmem:[#allocation6] sm:$0xff] (!%p1246_p0)  ;;  %s2665_s12 = sld [smem:[#allocation30_spill]] (!%p1246_p0)  ;;  %s2666_s28 = sld [smem:[#allocation32_spill]] (!%p1246_p0) }
 0x89e   : > { %v1252_v48 = vadd.f32 (!%p1246_p0), %v1251_v46, %v1250_v45 }
 0x8a0   : > { %v2447_v49 = vadd.f32 (!%p1246_p0), %v1682_v47, %v1252_v48  ;;  %s2660_s14 = smov (!%p1246_p0), %s2659_s22  ;;  %v1292_v56 = vld [vmem:[%s2659_s22] sm:$0xff] (!%p1246_p0) }
 0x8a1   : > { %v1293_v57 = vld [vmem:[%s2660_s14 + $0x8] sm:$0xff] (!%p1246_p0)  ;;  %v1294_v58 = vld [vmem:[%s2660_s14 + $0x10] sm:$0xff] (!%p1246_p0)  ;;  %v1295_v61 = vld [vmem:[%s2660_s14 + $0x18] sm:$0xff] (!%p1246_p0)  ;;  %s2662_s15 = smov (!%p1246_p0), %s2661_s18 }
 0x8a2   : > { %v1264_v50 = vsel %vm1263_vm13, %v2447_v49, 0.0  ;;  %v1854_v60 = vpack.c.bf16 %v1293_v57, %v1292_v56  ;;  %v1857_v63 = vpack.c.bf16 %v1295_v61, %v1294_v58  ;;  %v1381_v0 = vld [vmem:[%s2661_s18] sm:$0xff]  ;;  %v1382_v1 = vld [vmem:[%s2662_s15 + $0x8] sm:$0xff]  ;;  %v1383_v2 = vld [vmem:[%s2662_s15 + $0x10] sm:$0xff] }
 0x8a3   : > { %1265 = vadd.xlane.f32.xlu0 %v1264_v50  ;;  %v1860_v3 = vpack.c.bf16 %v1382_v1, %v1381_v0  ;;  %v1384_v4 = vld [vmem:[%s2662_s15 + $0x18] sm:$0xff]  ;;  %v1385_v6 = vld [vmem:[%s2662_s15 + $0x20] sm:$0xff]  ;;  %v1386_v7 = vld [vmem:[%s2662_s15 + $0x28] sm:$0xff] }
 0x8a4   : > { %1855 = vmatpush3.bf16.msra.mxu0 %v1854_v60  ;;  %v1863_v5 = vpack.c.bf16 %v1384_v4, %v1383_v2  ;;  %v1866_v8 = vpack.c.bf16 %v1386_v7, %v1385_v6  ;;  %v1683_v13 = vld [vmem:[%s2663_s0] ss:$0 sm:$0xff]  ;;  %v1387_v18 = vld [vmem:[%s2662_s15 + $0x30] sm:$0xff]  ;;  %v1388_v19 = vld [vmem:[%s2662_s15 + $0x38] sm:$0xff] }
 0x8a5   : > { %1856 = vmatprep.subr.bf16.mxu0 %v2158_v59  ;;  %1861 = vmatpush3.bf16.msra.mxu1 %v1860_v3  ;;  %v1684_v15 = vld [vmem:[%s2664_s11] ss:$0 sm:$0xff]  ;;  %v1869_v20 = vpack.c.bf16 %v1388_v19, %v1387_v18  ;;  %v1390_v22 = vld [vmem:[%s2662_s15 + $0x48] sm:$0xff]  ;;  %v1391_v24 = vld [vmem:[%s2662_s15 + $0x50] sm:$0xff] }
 0x8a6   : > { %1862 = vmatprep.subr.bf16.mxu1 %v2158_v59  ;;  %v1389_v21 = vld [vmem:[%s2662_s15 + $0x40] sm:$0xff]  ;;  %v1392_v25 = vld [vmem:[%s2662_s15 + $0x58] sm:$0xff]  ;;  %v1394_v28 = vld [vmem:[%s2662_s15 + $0x68] sm:$0xff] }
 0x8a7   : > { %v1872_v23 = vpack.c.bf16 %v1390_v22, %v1389_v21  ;;  %v1875_v26 = vpack.c.bf16 %v1392_v25, %v1391_v24  ;;  %v1393_v27 = vld [vmem:[%s2662_s15 + $0x60] sm:$0xff]  ;;  %v1395_v30 = vld [vmem:[%s2662_s15 + $0x70] sm:$0xff]  ;;  %v1396_v31 = vld [vmem:[%s2662_s15 + $0x78] sm:$0xff] }
 0x8a8   : > { %1858 = vmatpush3.bf16.msra.mxu0 %v1857_v63  ;;  %v1878_v29 = vpack.c.bf16 %v1394_v28, %v1393_v27  ;;  %v1881_v32 = vpack.c.bf16 %v1396_v31, %v1395_v30  ;;  %v1685_v33 = vld [vmem:[%s2665_s12] ss:$0 sm:$0xff] }
 0x8a9   : > { %1864 = vmatpush3.bf16.msra.mxu1 %v1863_v5  ;;  %v1687_v42 = vld [vmem:[%s2666_s28] ss:$0 sm:$0xff] }
 0x8aa   : > { %1865 = vmatprep.subr.bf16.mxu1 %v2158_v59 }
 0x8ad   : > { %1867 = vmatpush3.bf16.msra.mxu1 %v1866_v8 }
 0x8ae   : > { %1868 = vmatprep.subr.bf16.mxu1 %v2158_v59 }
 0x8b1   : > { %1870 = vmatpush3.bf16.msra.mxu1 %v1869_v20 }
 0x8b2   : > { %1871 = vmatprep.subr.bf16.mxu1 %v2158_v59 }
 0x8b5   : > { %1873 = vmatpush3.bf16.msra.mxu1 %v1872_v23 }
 0x8b6   : > { %1874 = vmatprep.subr.bf16.mxu1 %v2158_v59 }
 0x8b9   : > { %1876 = vmatpush3.bf16.msra.mxu1 %v1875_v26 }
 0x8ba   : > { %1877 = vmatprep.subr.bf16.mxu1 %v2158_v59 }
 0x8bd   : > { %1879 = vmatpush3.bf16.msra.mxu1 %v1878_v29 }
 0x8be   : > { %1880 = vmatprep.subr.bf16.mxu1 %v2158_v59 }
 0x8c1   : > { %1882 = vmatpush3.bf16.msra.mxu1 %v1881_v32 }
 0x930   : > { %v1266_v51 = vpop.xlane.xlu0 %1265 }
 0x931   : > { %v1268_v52 = vmul.f32 0.03125, %v1266_v51 }
 0x933   : > { %v1269_v53 = vsub.f32 %v2447_v49, %v1268_v52 }
 0x935   : > { %v1270_v54 = vmul.f32 %v1269_v53, %v1269_v53 }
 0x937   : > { %v1271_v55 = vsel %vm1263_vm13, %v1270_v54, 0.0 }
 0x938   : > { %1272 = vadd.xlane.f32.xlu0 %v1271_v55 }
 0x9c5   : > { %v1273_v9 = vpop.xlane.xlu0 %1272 }
 0x9c6   : > { %v1274_v10 = vmul.f32 0.03125, %v1273_v9 }
 0x9c8   : > { %v1275_v11 = vadd.f32 1e-05, %v1274_v10 }
 0x9ca   : > { %2014 = vrsqrt.f32 %v1275_v11 }
 0x9d4   : > { %v2015_v12 = vpop.eup %2014 }
 0x9d5   : > { %v1277_v14 = vmul.f32 %v2015_v12, %v1269_v53 }
 0x9d7   : > { %v1284_v16 = vmul.f32 %v1683_v13, %v1277_v14 }
 0x9d9   : > { %v1291_v17 = vadd.f32 %v1684_v15, %v1284_v16 }
 0x9db   : > { %1798 = vmatmul.mubr.msk.f32.vlgmr.msra.gmra.mrb[0].mxu0 %vm1263_vm13, %v1291_v17 }
 0xaae   : > { %v1372_v34 = vpop.f32.mrb[0].mxu0 }
 0xaaf   : > { %v1373_v35 = vadd.f32 %v1685_v33, %v1372_v34  ;;  %v1799_v36 = vpop.f32.mrb[1].mxu0 }
 0xab1   : > { %v1377_v37 = vmul.f32 0.70710677, %v1373_v35  ;;  %v1376_v39 = vmul.f32 0.5, %v1373_v35 }
 0xab3   : > { %2016 = verf.f32 %v1377_v37 }
 0xabd   : > { %v2017_v38 = vpop.eup %2016 }
 0xabe   : > { %v1379_v40 = vadd.f32 1.0, %v2017_v38 }
 0xac0   : > { %v1380_v41 = vmul.f32 %v1379_v40, %v1376_v39 }
 0xac2   : > { %1833 = vmatmul.mubr.f32.vlgmr.msra.gmra.mrb[0].mxu1 %v1380_v41 }
 0xb95   : > { %v1470_v43 = vpop.f32.mrb[0].mxu1 }
 0xb96   : > { %v1471_v44 = vadd.f32 %v1687_v42, %v1470_v43  ;;  %v1834_v45 = vpop.f32.mrb[1].mxu1 }
 0xb98   : > { %v1474_v46 = vadd.f32 %v1471_v44, %v2447_v49 }
 0xb9a   : > { %1475 = vst.msk [vmem:[%s604_s24] sm:$0xff] %vm1263_vm13, %v1474_v46 }
 0xb9b PF: > { %s2667_s20 = sld [smem:[#allocation13_spill]]  ;;  %s2668_s21 = sld [smem:[#allocation11_spill]] }
 0xb9c   : > { %s1492_s19 = sshll.u32 %s604_s24, 4  ;;  %s2670_s11 = sld [smem:[#allocation33_spill]]  ;;  %s2534_s19 = int_to_ptr.vmem [resolvable:$true] %s1492_s19 }
 0xb9d   : > { %s2018_s17 = scalar_lea.vmem %s2534_s19, 128 }
 0xb9e   : > { %p2019_p1 = scmp.ne.s32.totalorder %s2534_s19, %s2018_s17 }
 0xba0   : > { %p2020_p2 = pnand %p2019_p1, %p2315_p5 }
 0xba1   : > { %s1689_s25 = sshll.u32 %s2667_s20, 1  ;;  %s2671_s18 = sand.u32 1, %s2668_s21  }
 0xba2   : > { %s1488_s16 = sadd.s32 %s2120_s23, %s1689_s25  ;;  %s1477_s29 = scalar_lea.sflag [#allocation8], %s2671_s18 }
 0xba3   : > { %s1690_s0 = sshll.u32 %s1488_s16, 7  ;;  %p2021_p3 = pneg %p2020_p2 }
 0xba4   : > { %s1490_s13 = scalar_lea.hbm %s2670_s11, %s1690_s0  ;;  %s2161_s23 = smov [#allocation7]  }
 0xba5   : > { %s2022_s30 = sshll.u32 %s2161_s23, 4  ;;  %s2023_s30 = int_to_ptr.vmem [resolvable:$false] %s2022_s30 }
 0xba6   : > { %s2024_s24 = scalar_lea.vmem %s2023_s30, 256  ;;  %p2025_p4 = scmp.lt.s32.totalorder %s2534_s19, %s2023_s30 }
 0xba7   : > { %p2026_p6 = scmp.lt.s32.totalorder %s2024_s24, %s2018_s17 }
 0xba9   : > { %p2027_p8 = por %p2026_p6, %p2025_p4 }
 0xbab   : > { %p2028_p9 = pnand %p2027_p8, %p2021_p3 }
 0xbad   : > { %2031 = shalt.err (!%p2028_p9)
}
 0xbae   : > { %s2032_s12 = scalar_lea.hbm %s1490_s13, 128  ;;  %s2036_s28 = scalar_lea.hbm %s2670_s11, 512 }
 0xbaf   : > { %p2033_p10 = scmp.ne.s32.totalorder %s1490_s13, %s2032_s12  ;;  %p2037_p13 = scmp.lt.u32.totalorder %s1490_s13, %s2670_s11 }
 0xbb0   : > { %p2038_p0 = scmp.lt.u32.totalorder %s2036_s28, %s2032_s12  ;;  %p2040_p2 = scmp.lt.u32.totalorder %s2032_s12, %s1490_s13 }
 0xbb1   : > { %p2034_p11 = pnand %p2033_p10, %p2315_p5 }
 0xbb2   : > { %p2039_p1 = por %p2038_p0, %p2037_p13 }
 0xbb3   : > { %p2035_p12 = pneg %p2034_p11 }
 0xbb4   : > { %p2041_p4 = por %p2040_p2, %p2039_p1 }
 0xbb6   : > { %p2042_p3 = pnand %p2041_p4, %p2035_p12 }
 0xbb8   : > { %2045 = shalt.err (!%p2042_p3)
}
 0xbb9   : > { %1883 = dma.vmem_to_hbm [thread:$0]  (%p2315_p5), %s2534_s19, 128, %s1490_s13, %s1477_s29  }
 0xbba PF: > { %s2672_s25 = sld [smem:[#allocation18_spill]]  ;;  %s2673_s16 = sld [smem:[#allocation10_spill]] }
 0xbc0   : > { %p1889_p6 = scmp.ge.s32.totalorder %s2672_s25, 2  ;;  %s1504_s9 = sand.u32 1, %s2673_s16  }
 0xbc1   : > { %s1505_s10 = scalar_lea.sflag [#allocation8], %s1504_s9 }
 0xbc2   : > { %p1886_p8 = pnand %p1889_p6, %p2322_p7 }
 0xbc4   : > { %2095 = dma.done.wait (!%p1886_p8), %s1505_s10, 128  }
 0xbc5   : > { %2097 = vsyncadd (!%p1886_p8), %s1505_s10, 4294967168  ;;  %s28_s29 = sadd.s32 1, %s2672_s25   ;;  %s2675_s18 = sld [smem:[#allocation11_spill]] }
 0xbc6   : > { %p25_p9 = scmp.ge.s32.totalorder %s28_s29, 34   ;;  %s2676_s19 = sld [smem:[#allocation12_spill]] }
 0xbc7   : > { %s2677_s20 = sld [smem:[#allocation25_spill]]  ;;  %s2679_s22 = sld [smem:[#allocation15_spill]] }
 0xbc8   : > { %s2678_s21 = sld [smem:[#allocation14_spill]]  ;;  %s2680_s23 = sld [smem:[#allocation16_spill]] }
 0xbc9   : > { %s2681_s24 = sld [smem:[#allocation17_spill]]  ;;  %s2682_s25 = sld [smem:[#allocation19_spill]] }
 0xbca   : > { %s2683_s26 = sld [smem:[#allocation21_spill]]  ;;  %s2684_s27 = sld [smem:[#allocation23_spill]] }
 0xbcb   : > { %s2685_s28 = sld [smem:[#allocation24_spill]]  ;;  %27 = sbr.rel (!%p25_p9) target bundleno = 16 (0x10), region = 150 }
 0xbd2   :  { %1510 = vsyncpa [#allocation8], 1 }
 0xbd3   :  { %1512 = vsyncpa [#allocation8 + $0x1], 1 }

</bundles_post_ra>
